<compile_context>
chip_gen: v7x
topology: tpu7x:2x2x1
jax: 0.10.0
libtpu: 0.0.40
codegen_flags: <defaults>
</compile_context>

<pallas_src>
import functools

import jax
import jax.numpy as jnp
from jax.experimental import pallas as pl
from jax.experimental.pallas import tpu as pltpu


def _double_conv_kernel(x_ref, w1_ref, b1_ref, w2_ref, b2_ref, masks_ref,
                        o_ref, *, W):
    """One block of image PAIRS per grid step.

    x_ref    : (p_blk, 2C, HW)  packed image pairs, lane-dense spatial axis
    w*_ref   : (2C, 9*2C)       bf16 fused per-tap block-diagonal weights
    b*_ref   : (2C, 1)          f32 biases (tiled for both images of a pair)
    masks_ref: (9*2C, HW)       f32 SAME-padding validity masks, tap-major
    o_ref    : (p_blk, 2C, HW)  output
    """
    p_blk, C2, HW = o_ref.shape

    # Static lane-roll amounts for the 9 taps (kh-major, matching the host-side
    # weight / mask layout).  result[p] = img[(p + dh*W + dw) % HW].
    shifts = []
    for kh in range(3):
        for kw in range(3):
            dh, dw = kh - 1, kw - 1
            shifts.append((-(dh * W + dw)) % HW)

    w1 = w1_ref[...]          # (2C, 9*2C) bf16
    w2 = w2_ref[...]
    b1 = b1_ref[...]          # (2C, 1) f32
    b2 = b2_ref[...]

    def fused_conv(img, w_f, b_f):
        # img: (2C, HW) f32 -> (2C, HW) f32.
        pieces = []
        for t, s in enumerate(shifts):
            if s == 0:                      # centre tap: no shift, always valid
                pieces.append(img)
            else:
                rolled = pltpu.roll(img, s, 1)                  # XLU, co-issues
                pieces.append(masks_ref[pl.ds(C2 * t, C2), :] * rolled)
        # Tile-aligned sublane concat (each piece is exactly 2C=8 f32 rows),
        # then one cast + one MXU dot with f32 accumulation.
        stacked = jnp.concatenate(pieces, axis=0).astype(jnp.bfloat16)
        return jnp.dot(w_f, stacked, preferred_element_type=jnp.float32) + b_f

    def body(i, carry):
        img = x_ref[i].astype(jnp.float32)                      # (2C, HW)
        mid = jnp.maximum(fused_conv(img, w1, b1), 0.0)         # conv1 + ReLU
        out = fused_conv(mid, w2, b2)                           # conv2 + bias
        o_ref[i] = out.astype(o_ref.dtype)
        return carry

    # unrolled loop with bounded live ranges (avoids spill-prone Python unroll)
    jax.lax.fori_loop(0, p_blk, body, 0, unroll=True)


def _tensorcores_per_chip() -> int:
    """Best-effort TensorCore-per-chip count (perf-only; correctness unaffected)."""
    try:
        kind = jax.devices()[0].device_kind.lower()
    except Exception:
        return 1
    if "lite" in kind or "v5e" in kind or "v6e" in kind:
        return 1
    if "v7" in kind or "v5p" in kind or "v4" in kind:
        return 2
    return 1


def double_conv2d_channel_dim(x, w1, b1, w2, b2):
    """x: (N, F, C, H, W) float32; weights HWIO (3, 3, C, C); biases (C,)."""
    N, F, C, H, W = x.shape
    B = N * F
    HW = H * W
    C2 = 2 * C

    # Free reshapes only (contiguous collapses) -- no HBM transpose.
    xr = x.reshape(B, C, HW)
    pad = (-B) % 2
    if pad:  # pad to an even number of images so pairs pack cleanly
        xr = jnp.concatenate([xr, jnp.zeros((pad, C, HW), xr.dtype)], axis=0)
    P = (B + pad) // 2
    xp = xr.reshape(P, C2, HW)            # pack image pairs on the sublane axis

    # ---- tiny host-side weight prep -------------------------------------
    # HWIO (3,3,I,O) -> per-tap (O,I) -> block-diag (2C,2C) over the image pair
    # -> concatenated along K into one lane-dense (2C, 9*2C) bf16 operand.
    def fuse_weights(w):
        wt = w.reshape(9, C, C)                       # (tap, I, O)
        eye2 = jnp.eye(2, dtype=w.dtype)
        taps = [jnp.kron(eye2, wt[t].T) for t in range(9)]   # each (2C, 2C)
        return jnp.concatenate(taps, axis=1).astype(jnp.bfloat16)

    w1f = fuse_weights(w1)
    w2f = fuse_weights(w2)
    b1p = jnp.tile(b1, 2).reshape(C2, 1)
    b2p = jnp.tile(b2, 2).reshape(C2, 1)

    # ---- host-precomputed SAME-padding validity masks, (9*2C, HW) f32 ----
    # (centre-tap rows are all-ones and skipped in-kernel; kept only so that
    # tap t lives at rows [2C*t, 2C*(t+1)) for uniform aligned slicing)
    pos = jnp.arange(HW, dtype=jnp.int32)
    hh, ww = pos // W, pos % W
    mrows = []
    for kh in range(3):
        for kw in range(3):
            dh, dw = kh - 1, kw - 1
            valid = ((hh + dh >= 0) & (hh + dh < H) &
                     (ww + dw >= 0) & (ww + dw < W)).astype(jnp.float32)
            mrows.append(jnp.broadcast_to(valid[None, :], (C2, HW)))
    masks = jnp.concatenate(mrows, axis=0)            # (9*2C, HW)

    # One grid step on single-TC chips (v5e/v6e); two "parallel" steps on
    # dual-TC chips (v7x) so each TensorCore gets exactly one block.
    steps = 2 if (_tensorcores_per_chip() >= 2 and P % 2 == 0) else 1
    p_blk = P // steps

    kernel = functools.partial(_double_conv_kernel, W=W)

    out = pl.pallas_call(
        kernel,
        out_shape=jax.ShapeDtypeStruct((P, C2, HW), x.dtype),
        grid_spec=pltpu.PrefetchScalarGridSpec(
            num_scalar_prefetch=0,
            grid=(steps,),
            in_specs=[
                pl.BlockSpec((p_blk, C2, HW), lambda i: (i, 0, 0)),
                pl.BlockSpec((C2, 9 * C2), lambda i: (0, 0)),
                pl.BlockSpec((C2, 1), lambda i: (0, 0)),
                pl.BlockSpec((C2, 9 * C2), lambda i: (0, 0)),
                pl.BlockSpec((C2, 1), lambda i: (0, 0)),
                pl.BlockSpec((9 * C2, HW), lambda i: (0, 0)),
            ],
            out_specs=pl.BlockSpec((p_blk, C2, HW), lambda i: (i, 0, 0)),
        ),
        compiler_params=pltpu.CompilerParams(
            dimension_semantics=("parallel",)),
    )(xp, w1f, b1p, w2f, b2p, masks)

    # Free reshapes back to the module's (N, F, C, H, W) layout.
    out = out.reshape(P * 2, C, HW)
    if pad:
        out = out[:B]
    return out.reshape(N, F, C, H, W)


def _reference_forward(x, w1, b1, w2, b2):
    """Pure-JAX reference (matches the PyTorch double-conv building block)."""
    N, F, C, H, W = x.shape
    xb = x.reshape(N * F, C, H, W).transpose(0, 2, 3, 1)
    dn = ('NHWC', 'HWIO', 'NHWC')
    hp = jax.lax.Precision.HIGHEST
    y = jax.lax.conv_general_dilated(xb, w1, (1, 1), 'SAME',
                                     dimension_numbers=dn,
                                     precision=hp) + b1.reshape(1, 1, 1, C)
    y = jnp.maximum(y, 0.0)
    y = jax.lax.conv_general_dilated(y, w2, (1, 1), 'SAME',
                                     dimension_numbers=dn,
                                     precision=hp) + b2.reshape(1, 1, 1, C)
    return y.transpose(0, 3, 1, 2).reshape(N, F, C, H, W)


# TODO(synk): only the double 3x3 Conv2d+ReLU building block of MCNetV0_1 is
# implemented as a Pallas kernel; the Conv3d head/tail, weight norm,
# ConvTranspose3d and band-mean add/sub are not translated.  At production
# shapes, fusing several of these building-block applications (or a whole
# Layer/Block) into one pallas_call would amortise the fixed launch/step cost,
# which dominates at these tiny sizes.

if __name__ == "__main__":
    # small shapes consistent with the module's building block: x is (N, F, C, H, W)
    N, F, C, H, W = 2, 4, 4, 16, 16

    key = jax.random.PRNGKey(0)
    kx, kw1, kb1, kw2, kb2 = jax.random.split(key, 5)

    # deterministic "kaiming-uniform-like" init (Conv2d(C, C, 3, 3))
    fan_in = C * 3 * 3
    bound = 1.0 / (fan_in ** 0.5)
    w1 = jax.random.uniform(kw1, (3, 3, C, C), jnp.float32, -bound, bound)
    b1 = jax.random.uniform(kb1, (C,), jnp.float32, -bound, bound)
    w2 = jax.random.uniform(kw2, (3, 3, C, C), jnp.float32, -bound, bound)
    b2 = jax.random.uniform(kb2, (C,), jnp.float32, -bound, bound)

    x = jax.random.normal(kx, (N, F, C, H, W), jnp.float32)

    fwd = jax.jit(double_conv2d_channel_dim)
    out = jax.block_until_ready(fwd(x, w1, b1, w2, b2))

    ref = jax.block_until_ready(_reference_forward(x, w1, b1, w2, b2))
    assert out.shape == (N, F, C, H, W)
    # bf16 MXU operands with f32 accumulation (fan-in 36 per conv) -> use a
    # bf16-appropriate tolerance vs the f32 HIGHEST-precision reference.
    assert jnp.allclose(out, ref, atol=5e-3, rtol=5e-3), "mismatch vs reference"

    print("KERNEL_OK")
</pallas_src>

<mosaic_0001>
module attributes {stable_mosaic.version = 11 : i64} {
  func.func @_double_conv_kernel(%arg0: i32, %arg1: memref<4x8x256xf32, #tpu.memory_space<vmem>>, %arg2: memref<8x72xbf16, #tpu.memory_space<vmem>>, %arg3: memref<8x1xf32, #tpu.memory_space<vmem>>, %arg4: memref<8x72xbf16, #tpu.memory_space<vmem>>, %arg5: memref<8x1xf32, #tpu.memory_space<vmem>>, %arg6: memref<72x256xf32, #tpu.memory_space<vmem>>, %arg7: memref<4x8x256xf32, #tpu.memory_space<vmem>>) attributes {dimension_semantics = [#tpu.dimension_semantics<parallel>], iteration_bounds = array<i64: 1>, scalar_prefetch = 0 : i64, scratch_operands = 0 : i64, tpu.core_type = #tpu.core_type<tc>, window_params = [{transform_indices = @transform_0, window_bounds = array<i64: 4, 8, 256>}, {pipeline_mode = #tpu.pipeline_mode<synchronous>, transform_indices = @transform_1, window_bounds = array<i64: 8, 72>}, {pipeline_mode = #tpu.pipeline_mode<synchronous>, transform_indices = @transform_2, window_bounds = array<i64: 8, 1>}, {pipeline_mode = #tpu.pipeline_mode<synchronous>, transform_indices = @transform_3, window_bounds = array<i64: 8, 72>}, {pipeline_mode = #tpu.pipeline_mode<synchronous>, transform_indices = @transform_4, window_bounds = array<i64: 8, 1>}, {pipeline_mode = #tpu.pipeline_mode<synchronous>, transform_indices = @transform_5, window_bounds = array<i64: 72, 256>}, {transform_indices = @transform_6, window_bounds = array<i64: 4, 8, 256>}]} {
    %c0 = arith.constant 0 : index
    %c0_0 = arith.constant 0 : index
    %0 = vector.load %arg2[%c0, %c0_0] : memref<8x72xbf16, #tpu.memory_space<vmem>>, vector<8x72xbf16>
    %c0_1 = arith.constant 0 : index
    %c0_2 = arith.constant 0 : index
    %1 = vector.load %arg4[%c0_1, %c0_2] : memref<8x72xbf16, #tpu.memory_space<vmem>>, vector<8x72xbf16>
    %c0_3 = arith.constant 0 : index
    %c0_4 = arith.constant 0 : index
    %2 = vector.load %arg3[%c0_3, %c0_4] : memref<8x1xf32, #tpu.memory_space<vmem>>, vector<8x1xf32>
    %c0_5 = arith.constant 0 : index
    %c0_6 = arith.constant 0 : index
    %3 = vector.load %arg5[%c0_5, %c0_6] : memref<8x1xf32, #tpu.memory_space<vmem>>, vector<8x1xf32>
    %c0_i32 = arith.constant 0 : i32
    %4 = arith.index_cast %c0_i32 : i32 to index
    %c0_7 = arith.constant 0 : index
    %c0_8 = arith.constant 0 : index
    %5 = vector.load %arg1[%4, %c0_7, %c0_8] : memref<4x8x256xf32, #tpu.memory_space<vmem>>, vector<1x8x256xf32>
    %6 = vector.shape_cast %5 : vector<1x8x256xf32> to vector<8x256xf32>
    %c17_i32 = arith.constant 17 : i32
    %7 = tpu.dynamic_rotate %6 by %c17_i32 dim 1 : vector<8x256xf32>, i32 -> vector<8x256xf32>
    %c0_9 = arith.constant 0 : index
    %c0_10 = arith.constant 0 : index
    %8 = vector.load %arg6[%c0_9, %c0_10] : memref<72x256xf32, #tpu.memory_space<vmem>>, vector<8x256xf32>
    %9 = arith.mulf %8, %7 : vector<8x256xf32>
    %c16_i32 = arith.constant 16 : i32
    %10 = tpu.dynamic_rotate %6 by %c16_i32 dim 1 : vector<8x256xf32>, i32 -> vector<8x256xf32>
    %c8 = arith.constant 8 : index
    %c0_11 = arith.constant 0 : index
    %11 = vector.load %arg6[%c8, %c0_11] : memref<72x256xf32, #tpu.memory_space<vmem>>, vector<8x256xf32>
    %12 = arith.mulf %11, %10 : vector<8x256xf32>
    %c15_i32 = arith.constant 15 : i32
    %13 = tpu.dynamic_rotate %6 by %c15_i32 dim 1 : vector<8x256xf32>, i32 -> vector<8x256xf32>
    %c16 = arith.constant 16 : index
    %c0_12 = arith.constant 0 : index
    %14 = vector.load %arg6[%c16, %c0_12] : memref<72x256xf32, #tpu.memory_space<vmem>>, vector<8x256xf32>
    %15 = arith.mulf %14, %13 : vector<8x256xf32>
    %c1_i32 = arith.constant 1 : i32
    %16 = tpu.dynamic_rotate %6 by %c1_i32 dim 1 : vector<8x256xf32>, i32 -> vector<8x256xf32>
    %c24 = arith.constant 24 : index
    %c0_13 = arith.constant 0 : index
    %17 = vector.load %arg6[%c24, %c0_13] : memref<72x256xf32, #tpu.memory_space<vmem>>, vector<8x256xf32>
    %18 = arith.mulf %17, %16 : vector<8x256xf32>
    %c255_i32 = arith.constant 255 : i32
    %19 = tpu.dynamic_rotate %6 by %c255_i32 dim 1 : vector<8x256xf32>, i32 -> vector<8x256xf32>
    %c40 = arith.constant 40 : index
    %c0_14 = arith.constant 0 : index
    %20 = vector.load %arg6[%c40, %c0_14] : memref<72x256xf32, #tpu.memory_space<vmem>>, vector<8x256xf32>
    %21 = arith.mulf %20, %19 : vector<8x256xf32>
    %c241_i32 = arith.constant 241 : i32
    %22 = tpu.dynamic_rotate %6 by %c241_i32 dim 1 : vector<8x256xf32>, i32 -> vector<8x256xf32>
    %c48 = arith.constant 48 : index
    %c0_15 = arith.constant 0 : index
    %23 = vector.load %arg6[%c48, %c0_15] : memref<72x256xf32, #tpu.memory_space<vmem>>, vector<8x256xf32>
    %24 = arith.mulf %23, %22 : vector<8x256xf32>
    %c240_i32 = arith.constant 240 : i32
    %25 = tpu.dynamic_rotate %6 by %c240_i32 dim 1 : vector<8x256xf32>, i32 -> vector<8x256xf32>
    %c56 = arith.constant 56 : index
    %c0_16 = arith.constant 0 : index
    %26 = vector.load %arg6[%c56, %c0_16] : memref<72x256xf32, #tpu.memory_space<vmem>>, vector<8x256xf32>
    %27 = arith.mulf %26, %25 : vector<8x256xf32>
    %c239_i32 = arith.constant 239 : i32
    %28 = tpu.dynamic_rotate %6 by %c239_i32 dim 1 : vector<8x256xf32>, i32 -> vector<8x256xf32>
    %c64 = arith.constant 64 : index
    %c0_17 = arith.constant 0 : index
    %29 = vector.load %arg6[%c64, %c0_17] : memref<72x256xf32, #tpu.memory_space<vmem>>, vector<8x256xf32>
    %30 = arith.mulf %29, %28 : vector<8x256xf32>
    %31 = tpu.concatenate %9, %12, %15, %18, %6, %21, %24, %27, %30 in 0 : vector<8x256xf32>, vector<8x256xf32>, vector<8x256xf32>, vector<8x256xf32>, vector<8x256xf32>, vector<8x256xf32>, vector<8x256xf32>, vector<8x256xf32>, vector<8x256xf32> -> vector<72x256xf32>
    %32 = arith.truncf %31 : vector<72x256xf32> to vector<72x256xbf16>
    %cst = arith.constant dense<0.000000e+00> : vector<8x256xf32>
    %33 = tpu.matmul %0, %32, %cst {dimension_numbers = #tpu.dot_dimension_numbers<[1], [0], [0], [1], [0, 0, 1, 1], [], []>} : vector<8x72xbf16>, vector<72x256xbf16>, vector<8x256xf32> -> vector<8x256xf32>
    %34 = vector.broadcast %2 : vector<8x1xf32> to vector<8x256xf32>
    %35 = arith.addf %33, %34 : vector<8x256xf32>
    %cst_18 = arith.constant 0.000000e+00 : f32
    %36 = vector.broadcast %cst_18 : f32 to vector<8x256xf32>
    %37 = arith.maximumf %35, %36 : vector<8x256xf32>
    %c17_i32_19 = arith.constant 17 : i32
    %38 = tpu.dynamic_rotate %37 by %c17_i32_19 dim 1 : vector<8x256xf32>, i32 -> vector<8x256xf32>
    %c0_20 = arith.constant 0 : index
    %c0_21 = arith.constant 0 : index
    %39 = vector.load %arg6[%c0_20, %c0_21] : memref<72x256xf32, #tpu.memory_space<vmem>>, vector<8x256xf32>
    %40 = arith.mulf %39, %38 : vector<8x256xf32>
    %c16_i32_22 = arith.constant 16 : i32
    %41 = tpu.dynamic_rotate %37 by %c16_i32_22 dim 1 : vector<8x256xf32>, i32 -> vector<8x256xf32>
    %c8_23 = arith.constant 8 : index
    %c0_24 = arith.constant 0 : index
    %42 = vector.load %arg6[%c8_23, %c0_24] : memref<72x256xf32, #tpu.memory_space<vmem>>, vector<8x256xf32>
    %43 = arith.mulf %42, %41 : vector<8x256xf32>
    %c15_i32_25 = arith.constant 15 : i32
    %44 = tpu.dynamic_rotate %37 by %c15_i32_25 dim 1 : vector<8x256xf32>, i32 -> vector<8x256xf32>
    %c16_26 = arith.constant 16 : index
    %c0_27 = arith.constant 0 : index
    %45 = vector.load %arg6[%c16_26, %c0_27] : memref<72x256xf32, #tpu.memory_space<vmem>>, vector<8x256xf32>
    %46 = arith.mulf %45, %44 : vector<8x256xf32>
    %c1_i32_28 = arith.constant 1 : i32
    %47 = tpu.dynamic_rotate %37 by %c1_i32_28 dim 1 : vector<8x256xf32>, i32 -> vector<8x256xf32>
    %c24_29 = arith.constant 24 : index
    %c0_30 = arith.constant 0 : index
    %48 = vector.load %arg6[%c24_29, %c0_30] : memref<72x256xf32, #tpu.memory_space<vmem>>, vector<8x256xf32>
    %49 = arith.mulf %48, %47 : vector<8x256xf32>
    %c255_i32_31 = arith.constant 255 : i32
    %50 = tpu.dynamic_rotate %37 by %c255_i32_31 dim 1 : vector<8x256xf32>, i32 -> vector<8x256xf32>
    %c40_32 = arith.constant 40 : index
    %c0_33 = arith.constant 0 : index
    %51 = vector.load %arg6[%c40_32, %c0_33] : memref<72x256xf32, #tpu.memory_space<vmem>>, vector<8x256xf32>
    %52 = arith.mulf %51, %50 : vector<8x256xf32>
    %c241_i32_34 = arith.constant 241 : i32
    %53 = tpu.dynamic_rotate %37 by %c241_i32_34 dim 1 : vector<8x256xf32>, i32 -> vector<8x256xf32>
    %c48_35 = arith.constant 48 : index
    %c0_36 = arith.constant 0 : index
    %54 = vector.load %arg6[%c48_35, %c0_36] : memref<72x256xf32, #tpu.memory_space<vmem>>, vector<8x256xf32>
    %55 = arith.mulf %54, %53 : vector<8x256xf32>
    %c240_i32_37 = arith.constant 240 : i32
    %56 = tpu.dynamic_rotate %37 by %c240_i32_37 dim 1 : vector<8x256xf32>, i32 -> vector<8x256xf32>
    %c56_38 = arith.constant 56 : index
    %c0_39 = arith.constant 0 : index
    %57 = vector.load %arg6[%c56_38, %c0_39] : memref<72x256xf32, #tpu.memory_space<vmem>>, vector<8x256xf32>
    %58 = arith.mulf %57, %56 : vector<8x256xf32>
    %c239_i32_40 = arith.constant 239 : i32
    %59 = tpu.dynamic_rotate %37 by %c239_i32_40 dim 1 : vector<8x256xf32>, i32 -> vector<8x256xf32>
    %c64_41 = arith.constant 64 : index
    %c0_42 = arith.constant 0 : index
    %60 = vector.load %arg6[%c64_41, %c0_42] : memref<72x256xf32, #tpu.memory_space<vmem>>, vector<8x256xf32>
    %61 = arith.mulf %60, %59 : vector<8x256xf32>
    %62 = tpu.concatenate %40, %43, %46, %49, %37, %52, %55, %58, %61 in 0 : vector<8x256xf32>, vector<8x256xf32>, vector<8x256xf32>, vector<8x256xf32>, vector<8x256xf32>, vector<8x256xf32>, vector<8x256xf32>, vector<8x256xf32>, vector<8x256xf32> -> vector<72x256xf32>
    %63 = arith.truncf %62 : vector<72x256xf32> to vector<72x256xbf16>
    %cst_43 = arith.constant dense<0.000000e+00> : vector<8x256xf32>
    %64 = tpu.matmul %1, %63, %cst_43 {dimension_numbers = #tpu.dot_dimension_numbers<[1], [0], [0], [1], [0, 0, 1, 1], [], []>} : vector<8x72xbf16>, vector<72x256xbf16>, vector<8x256xf32> -> vector<8x256xf32>
    %65 = vector.broadcast %3 : vector<8x1xf32> to vector<8x256xf32>
    %66 = arith.addf %64, %65 : vector<8x256xf32>
    %67 = arith.index_cast %c0_i32 : i32 to index
    %c0_44 = arith.constant 0 : index
    %c0_45 = arith.constant 0 : index
    %68 = vector.load %arg7[%67, %c0_44, %c0_45] : memref<4x8x256xf32, #tpu.memory_space<vmem>>, vector<1x8x256xf32>
    %69 = vector.shape_cast %68 : vector<1x8x256xf32> to vector<8x256xf32>
    %70 = vector.shape_cast %66 : vector<8x256xf32> to vector<1x8x256xf32>
    tpu.vector_store %arg7[%67, %c0_44, %c0_45], %70 {strides = array<i32>} : memref<4x8x256xf32, #tpu.memory_space<vmem>>, vector<1x8x256xf32>,
    %c1_i32_46 = arith.constant 1 : i32
    %71 = arith.index_cast %c1_i32_46 : i32 to index
    %c0_47 = arith.constant 0 : index
    %c0_48 = arith.constant 0 : index
    %72 = vector.load %arg1[%71, %c0_47, %c0_48] : memref<4x8x256xf32, #tpu.memory_space<vmem>>, vector<1x8x256xf32>
    %73 = vector.shape_cast %72 : vector<1x8x256xf32> to vector<8x256xf32>
    %c17_i32_49 = arith.constant 17 : i32
    %74 = tpu.dynamic_rotate %73 by %c17_i32_49 dim 1 : vector<8x256xf32>, i32 -> vector<8x256xf32>
    %c0_50 = arith.constant 0 : index
    %c0_51 = arith.constant 0 : index
    %75 = vector.load %arg6[%c0_50, %c0_51] : memref<72x256xf32, #tpu.memory_space<vmem>>, vector<8x256xf32>
    %76 = arith.mulf %75, %74 : vector<8x256xf32>
    %c16_i32_52 = arith.constant 16 : i32
    %77 = tpu.dynamic_rotate %73 by %c16_i32_52 dim 1 : vector<8x256xf32>, i32 -> vector<8x256xf32>
    %c8_53 = arith.constant 8 : index
    %c0_54 = arith.constant 0 : index
    %78 = vector.load %arg6[%c8_53, %c0_54] : memref<72x256xf32, #tpu.memory_space<vmem>>, vector<8x256xf32>
    %79 = arith.mulf %78, %77 : vector<8x256xf32>
    %c15_i32_55 = arith.constant 15 : i32
    %80 = tpu.dynamic_rotate %73 by %c15_i32_55 dim 1 : vector<8x256xf32>, i32 -> vector<8x256xf32>
    %c16_56 = arith.constant 16 : index
    %c0_57 = arith.constant 0 : index
    %81 = vector.load %arg6[%c16_56, %c0_57] : memref<72x256xf32, #tpu.memory_space<vmem>>, vector<8x256xf32>
    %82 = arith.mulf %81, %80 : vector<8x256xf32>
    %c1_i32_58 = arith.constant 1 : i32
    %83 = tpu.dynamic_rotate %73 by %c1_i32_58 dim 1 : vector<8x256xf32>, i32 -> vector<8x256xf32>
    %c24_59 = arith.constant 24 : index
    %c0_60 = arith.constant 0 : index
    %84 = vector.load %arg6[%c24_59, %c0_60] : memref<72x256xf32, #tpu.memory_space<vmem>>, vector<8x256xf32>
    %85 = arith.mulf %84, %83 : vector<8x256xf32>
    %c255_i32_61 = arith.constant 255 : i32
    %86 = tpu.dynamic_rotate %73 by %c255_i32_61 dim 1 : vector<8x256xf32>, i32 -> vector<8x256xf32>
    %c40_62 = arith.constant 40 : index
    %c0_63 = arith.constant 0 : index
    %87 = vector.load %arg6[%c40_62, %c0_63] : memref<72x256xf32, #tpu.memory_space<vmem>>, vector<8x256xf32>
    %88 = arith.mulf %87, %86 : vector<8x256xf32>
    %c241_i32_64 = arith.constant 241 : i32
    %89 = tpu.dynamic_rotate %73 by %c241_i32_64 dim 1 : vector<8x256xf32>, i32 -> vector<8x256xf32>
    %c48_65 = arith.constant 48 : index
    %c0_66 = arith.constant 0 : index
    %90 = vector.load %arg6[%c48_65, %c0_66] : memref<72x256xf32, #tpu.memory_space<vmem>>, vector<8x256xf32>
    %91 = arith.mulf %90, %89 : vector<8x256xf32>
    %c240_i32_67 = arith.constant 240 : i32
    %92 = tpu.dynamic_rotate %73 by %c240_i32_67 dim 1 : vector<8x256xf32>, i32 -> vector<8x256xf32>
    %c56_68 = arith.constant 56 : index
    %c0_69 = arith.constant 0 : index
    %93 = vector.load %arg6[%c56_68, %c0_69] : memref<72x256xf32, #tpu.memory_space<vmem>>, vector<8x256xf32>
    %94 = arith.mulf %93, %92 : vector<8x256xf32>
    %c239_i32_70 = arith.constant 239 : i32
    %95 = tpu.dynamic_rotate %73 by %c239_i32_70 dim 1 : vector<8x256xf32>, i32 -> vector<8x256xf32>
    %c64_71 = arith.constant 64 : index
    %c0_72 = arith.constant 0 : index
    %96 = vector.load %arg6[%c64_71, %c0_72] : memref<72x256xf32, #tpu.memory_space<vmem>>, vector<8x256xf32>
    %97 = arith.mulf %96, %95 : vector<8x256xf32>
    %98 = tpu.concatenate %76, %79, %82, %85, %73, %88, %91, %94, %97 in 0 : vector<8x256xf32>, vector<8x256xf32>, vector<8x256xf32>, vector<8x256xf32>, vector<8x256xf32>, vector<8x256xf32>, vector<8x256xf32>, vector<8x256xf32>, vector<8x256xf32> -> vector<72x256xf32>
    %99 = arith.truncf %98 : vector<72x256xf32> to vector<72x256xbf16>
    %cst_73 = arith.constant dense<0.000000e+00> : vector<8x256xf32>
    %100 = tpu.matmul %0, %99, %cst_73 {dimension_numbers = #tpu.dot_dimension_numbers<[1], [0], [0], [1], [0, 0, 1, 1], [], []>} : vector<8x72xbf16>, vector<72x256xbf16>, vector<8x256xf32> -> vector<8x256xf32>
    %101 = vector.broadcast %2 : vector<8x1xf32> to vector<8x256xf32>
    %102 = arith.addf %100, %101 : vector<8x256xf32>
    %cst_74 = arith.constant 0.000000e+00 : f32
    %103 = vector.broadcast %cst_74 : f32 to vector<8x256xf32>
    %104 = arith.maximumf %102, %103 : vector<8x256xf32>
    %c17_i32_75 = arith.constant 17 : i32
    %105 = tpu.dynamic_rotate %104 by %c17_i32_75 dim 1 : vector<8x256xf32>, i32 -> vector<8x256xf32>
    %c0_76 = arith.constant 0 : index
    %c0_77 = arith.constant 0 : index
    %106 = vector.load %arg6[%c0_76, %c0_77] : memref<72x256xf32, #tpu.memory_space<vmem>>, vector<8x256xf32>
    %107 = arith.mulf %106, %105 : vector<8x256xf32>
    %c16_i32_78 = arith.constant 16 : i32
    %108 = tpu.dynamic_rotate %104 by %c16_i32_78 dim 1 : vector<8x256xf32>, i32 -> vector<8x256xf32>
    %c8_79 = arith.constant 8 : index
    %c0_80 = arith.constant 0 : index
    %109 = vector.load %arg6[%c8_79, %c0_80] : memref<72x256xf32, #tpu.memory_space<vmem>>, vector<8x256xf32>
    %110 = arith.mulf %109, %108 : vector<8x256xf32>
    %c15_i32_81 = arith.constant 15 : i32
    %111 = tpu.dynamic_rotate %104 by %c15_i32_81 dim 1 : vector<8x256xf32>, i32 -> vector<8x256xf32>
    %c16_82 = arith.constant 16 : index
    %c0_83 = arith.constant 0 : index
    %112 = vector.load %arg6[%c16_82, %c0_83] : memref<72x256xf32, #tpu.memory_space<vmem>>, vector<8x256xf32>
    %113 = arith.mulf %112, %111 : vector<8x256xf32>
    %c1_i32_84 = arith.constant 1 : i32
    %114 = tpu.dynamic_rotate %104 by %c1_i32_84 dim 1 : vector<8x256xf32>, i32 -> vector<8x256xf32>
    %c24_85 = arith.constant 24 : index
    %c0_86 = arith.constant 0 : index
    %115 = vector.load %arg6[%c24_85, %c0_86] : memref<72x256xf32, #tpu.memory_space<vmem>>, vector<8x256xf32>
    %116 = arith.mulf %115, %114 : vector<8x256xf32>
    %c255_i32_87 = arith.constant 255 : i32
    %117 = tpu.dynamic_rotate %104 by %c255_i32_87 dim 1 : vector<8x256xf32>, i32 -> vector<8x256xf32>
    %c40_88 = arith.constant 40 : index
    %c0_89 = arith.constant 0 : index
    %118 = vector.load %arg6[%c40_88, %c0_89] : memref<72x256xf32, #tpu.memory_space<vmem>>, vector<8x256xf32>
    %119 = arith.mulf %118, %117 : vector<8x256xf32>
    %c241_i32_90 = arith.constant 241 : i32
    %120 = tpu.dynamic_rotate %104 by %c241_i32_90 dim 1 : vector<8x256xf32>, i32 -> vector<8x256xf32>
    %c48_91 = arith.constant 48 : index
    %c0_92 = arith.constant 0 : index
    %121 = vector.load %arg6[%c48_91, %c0_92] : memref<72x256xf32, #tpu.memory_space<vmem>>, vector<8x256xf32>
    %122 = arith.mulf %121, %120 : vector<8x256xf32>
    %c240_i32_93 = arith.constant 240 : i32
    %123 = tpu.dynamic_rotate %104 by %c240_i32_93 dim 1 : vector<8x256xf32>, i32 -> vector<8x256xf32>
    %c56_94 = arith.constant 56 : index
    %c0_95 = arith.constant 0 : index
    %124 = vector.load %arg6[%c56_94, %c0_95] : memref<72x256xf32, #tpu.memory_space<vmem>>, vector<8x256xf32>
    %125 = arith.mulf %124, %123 : vector<8x256xf32>
    %c239_i32_96 = arith.constant 239 : i32
    %126 = tpu.dynamic_rotate %104 by %c239_i32_96 dim 1 : vector<8x256xf32>, i32 -> vector<8x256xf32>
    %c64_97 = arith.constant 64 : index
    %c0_98 = arith.constant 0 : index
    %127 = vector.load %arg6[%c64_97, %c0_98] : memref<72x256xf32, #tpu.memory_space<vmem>>, vector<8x256xf32>
    %128 = arith.mulf %127, %126 : vector<8x256xf32>
    %129 = tpu.concatenate %107, %110, %113, %116, %104, %119, %122, %125, %128 in 0 : vector<8x256xf32>, vector<8x256xf32>, vector<8x256xf32>, vector<8x256xf32>, vector<8x256xf32>, vector<8x256xf32>, vector<8x256xf32>, vector<8x256xf32>, vector<8x256xf32> -> vector<72x256xf32>
    %130 = arith.truncf %129 : vector<72x256xf32> to vector<72x256xbf16>
    %cst_99 = arith.constant dense<0.000000e+00> : vector<8x256xf32>
    %131 = tpu.matmul %1, %130, %cst_99 {dimension_numbers = #tpu.dot_dimension_numbers<[1], [0], [0], [1], [0, 0, 1, 1], [], []>} : vector<8x72xbf16>, vector<72x256xbf16>, vector<8x256xf32> -> vector<8x256xf32>
    %132 = vector.broadcast %3 : vector<8x1xf32> to vector<8x256xf32>
    %133 = arith.addf %131, %132 : vector<8x256xf32>
    %134 = arith.index_cast %c1_i32_46 : i32 to index
    %c0_100 = arith.constant 0 : index
    %c0_101 = arith.constant 0 : index
    %135 = vector.load %arg7[%134, %c0_100, %c0_101] : memref<4x8x256xf32, #tpu.memory_space<vmem>>, vector<1x8x256xf32>
    %136 = vector.shape_cast %135 : vector<1x8x256xf32> to vector<8x256xf32>
    %137 = vector.shape_cast %133 : vector<8x256xf32> to vector<1x8x256xf32>
    tpu.vector_store %arg7[%134, %c0_100, %c0_101], %137 {strides = array<i32>} : memref<4x8x256xf32, #tpu.memory_space<vmem>>, vector<1x8x256xf32>,
    %c2_i32 = arith.constant 2 : i32
    %138 = arith.index_cast %c2_i32 : i32 to index
    %c0_102 = arith.constant 0 : index
    %c0_103 = arith.constant 0 : index
    %139 = vector.load %arg1[%138, %c0_102, %c0_103] : memref<4x8x256xf32, #tpu.memory_space<vmem>>, vector<1x8x256xf32>
    %140 = vector.shape_cast %139 : vector<1x8x256xf32> to vector<8x256xf32>
    %c17_i32_104 = arith.constant 17 : i32
    %141 = tpu.dynamic_rotate %140 by %c17_i32_104 dim 1 : vector<8x256xf32>, i32 -> vector<8x256xf32>
    %c0_105 = arith.constant 0 : index
    %c0_106 = arith.constant 0 : index
    %142 = vector.load %arg6[%c0_105, %c0_106] : memref<72x256xf32, #tpu.memory_space<vmem>>, vector<8x256xf32>
    %143 = arith.mulf %142, %141 : vector<8x256xf32>
    %c16_i32_107 = arith.constant 16 : i32
    %144 = tpu.dynamic_rotate %140 by %c16_i32_107 dim 1 : vector<8x256xf32>, i32 -> vector<8x256xf32>
    %c8_108 = arith.constant 8 : index
    %c0_109 = arith.constant 0 : index
    %145 = vector.load %arg6[%c8_108, %c0_109] : memref<72x256xf32, #tpu.memory_space<vmem>>, vector<8x256xf32>
    %146 = arith.mulf %145, %144 : vector<8x256xf32>
    %c15_i32_110 = arith.constant 15 : i32
    %147 = tpu.dynamic_rotate %140 by %c15_i32_110 dim 1 : vector<8x256xf32>, i32 -> vector<8x256xf32>
    %c16_111 = arith.constant 16 : index
    %c0_112 = arith.constant 0 : index
    %148 = vector.load %arg6[%c16_111, %c0_112] : memref<72x256xf32, #tpu.memory_space<vmem>>, vector<8x256xf32>
    %149 = arith.mulf %148, %147 : vector<8x256xf32>
    %c1_i32_113 = arith.constant 1 : i32
    %150 = tpu.dynamic_rotate %140 by %c1_i32_113 dim 1 : vector<8x256xf32>, i32 -> vector<8x256xf32>
    %c24_114 = arith.constant 24 : index
    %c0_115 = arith.constant 0 : index
    %151 = vector.load %arg6[%c24_114, %c0_115] : memref<72x256xf32, #tpu.memory_space<vmem>>, vector<8x256xf32>
    %152 = arith.mulf %151, %150 : vector<8x256xf32>
    %c255_i32_116 = arith.constant 255 : i32
    %153 = tpu.dynamic_rotate %140 by %c255_i32_116 dim 1 : vector<8x256xf32>, i32 -> vector<8x256xf32>
    %c40_117 = arith.constant 40 : index
    %c0_118 = arith.constant 0 : index
    %154 = vector.load %arg6[%c40_117, %c0_118] : memref<72x256xf32, #tpu.memory_space<vmem>>, vector<8x256xf32>
    %155 = arith.mulf %154, %153 : vector<8x256xf32>
    %c241_i32_119 = arith.constant 241 : i32
    %156 = tpu.dynamic_rotate %140 by %c241_i32_119 dim 1 : vector<8x256xf32>, i32 -> vector<8x256xf32>
    %c48_120 = arith.constant 48 : index
    %c0_121 = arith.constant 0 : index
    %157 = vector.load %arg6[%c48_120, %c0_121] : memref<72x256xf32, #tpu.memory_space<vmem>>, vector<8x256xf32>
    %158 = arith.mulf %157, %156 : vector<8x256xf32>
    %c240_i32_122 = arith.constant 240 : i32
    %159 = tpu.dynamic_rotate %140 by %c240_i32_122 dim 1 : vector<8x256xf32>, i32 -> vector<8x256xf32>
    %c56_123 = arith.constant 56 : index
    %c0_124 = arith.constant 0 : index
    %160 = vector.load %arg6[%c56_123, %c0_124] : memref<72x256xf32, #tpu.memory_space<vmem>>, vector<8x256xf32>
    %161 = arith.mulf %160, %159 : vector<8x256xf32>
    %c239_i32_125 = arith.constant 239 : i32
    %162 = tpu.dynamic_rotate %140 by %c239_i32_125 dim 1 : vector<8x256xf32>, i32 -> vector<8x256xf32>
    %c64_126 = arith.constant 64 : index
    %c0_127 = arith.constant 0 : index
    %163 = vector.load %arg6[%c64_126, %c0_127] : memref<72x256xf32, #tpu.memory_space<vmem>>, vector<8x256xf32>
    %164 = arith.mulf %163, %162 : vector<8x256xf32>
    %165 = tpu.concatenate %143, %146, %149, %152, %140, %155, %158, %161, %164 in 0 : vector<8x256xf32>, vector<8x256xf32>, vector<8x256xf32>, vector<8x256xf32>, vector<8x256xf32>, vector<8x256xf32>, vector<8x256xf32>, vector<8x256xf32>, vector<8x256xf32> -> vector<72x256xf32>
    %166 = arith.truncf %165 : vector<72x256xf32> to vector<72x256xbf16>
    %cst_128 = arith.constant dense<0.000000e+00> : vector<8x256xf32>
    %167 = tpu.matmul %0, %166, %cst_128 {dimension_numbers = #tpu.dot_dimension_numbers<[1], [0], [0], [1], [0, 0, 1, 1], [], []>} : vector<8x72xbf16>, vector<72x256xbf16>, vector<8x256xf32> -> vector<8x256xf32>
    %168 = vector.broadcast %2 : vector<8x1xf32> to vector<8x256xf32>
    %169 = arith.addf %167, %168 : vector<8x256xf32>
    %cst_129 = arith.constant 0.000000e+00 : f32
    %170 = vector.broadcast %cst_129 : f32 to vector<8x256xf32>
    %171 = arith.maximumf %169, %170 : vector<8x256xf32>
    %c17_i32_130 = arith.constant 17 : i32
    %172 = tpu.dynamic_rotate %171 by %c17_i32_130 dim 1 : vector<8x256xf32>, i32 -> vector<8x256xf32>
    %c0_131 = arith.constant 0 : index
    %c0_132 = arith.constant 0 : index
    %173 = vector.load %arg6[%c0_131, %c0_132] : memref<72x256xf32, #tpu.memory_space<vmem>>, vector<8x256xf32>
    %174 = arith.mulf %173, %172 : vector<8x256xf32>
    %c16_i32_133 = arith.constant 16 : i32
    %175 = tpu.dynamic_rotate %171 by %c16_i32_133 dim 1 : vector<8x256xf32>, i32 -> vector<8x256xf32>
    %c8_134 = arith.constant 8 : index
    %c0_135 = arith.constant 0 : index
    %176 = vector.load %arg6[%c8_134, %c0_135] : memref<72x256xf32, #tpu.memory_space<vmem>>, vector<8x256xf32>
    %177 = arith.mulf %176, %175 : vector<8x256xf32>
    %c15_i32_136 = arith.constant 15 : i32
    %178 = tpu.dynamic_rotate %171 by %c15_i32_136 dim 1 : vector<8x256xf32>, i32 -> vector<8x256xf32>
    %c16_137 = arith.constant 16 : index
    %c0_138 = arith.constant 0 : index
    %179 = vector.load %arg6[%c16_137, %c0_138] : memref<72x256xf32, #tpu.memory_space<vmem>>, vector<8x256xf32>
    %180 = arith.mulf %179, %178 : vector<8x256xf32>
    %c1_i32_139 = arith.constant 1 : i32
    %181 = tpu.dynamic_rotate %171 by %c1_i32_139 dim 1 : vector<8x256xf32>, i32 -> vector<8x256xf32>
    %c24_140 = arith.constant 24 : index
    %c0_141 = arith.constant 0 : index
    %182 = vector.load %arg6[%c24_140, %c0_141] : memref<72x256xf32, #tpu.memory_space<vmem>>, vector<8x256xf32>
    %183 = arith.mulf %182, %181 : vector<8x256xf32>
    %c255_i32_142 = arith.constant 255 : i32
    %184 = tpu.dynamic_rotate %171 by %c255_i32_142 dim 1 : vector<8x256xf32>, i32 -> vector<8x256xf32>
    %c40_143 = arith.constant 40 : index
    %c0_144 = arith.constant 0 : index
    %185 = vector.load %arg6[%c40_143, %c0_144] : memref<72x256xf32, #tpu.memory_space<vmem>>, vector<8x256xf32>
    %186 = arith.mulf %185, %184 : vector<8x256xf32>
    %c241_i32_145 = arith.constant 241 : i32
    %187 = tpu.dynamic_rotate %171 by %c241_i32_145 dim 1 : vector<8x256xf32>, i32 -> vector<8x256xf32>
    %c48_146 = arith.constant 48 : index
    %c0_147 = arith.constant 0 : index
    %188 = vector.load %arg6[%c48_146, %c0_147] : memref<72x256xf32, #tpu.memory_space<vmem>>, vector<8x256xf32>
    %189 = arith.mulf %188, %187 : vector<8x256xf32>
    %c240_i32_148 = arith.constant 240 : i32
    %190 = tpu.dynamic_rotate %171 by %c240_i32_148 dim 1 : vector<8x256xf32>, i32 -> vector<8x256xf32>
    %c56_149 = arith.constant 56 : index
    %c0_150 = arith.constant 0 : index
    %191 = vector.load %arg6[%c56_149, %c0_150] : memref<72x256xf32, #tpu.memory_space<vmem>>, vector<8x256xf32>
    %192 = arith.mulf %191, %190 : vector<8x256xf32>
    %c239_i32_151 = arith.constant 239 : i32
    %193 = tpu.dynamic_rotate %171 by %c239_i32_151 dim 1 : vector<8x256xf32>, i32 -> vector<8x256xf32>
    %c64_152 = arith.constant 64 : index
    %c0_153 = arith.constant 0 : index
    %194 = vector.load %arg6[%c64_152, %c0_153] : memref<72x256xf32, #tpu.memory_space<vmem>>, vector<8x256xf32>
    %195 = arith.mulf %194, %193 : vector<8x256xf32>
    %196 = tpu.concatenate %174, %177, %180, %183, %171, %186, %189, %192, %195 in 0 : vector<8x256xf32>, vector<8x256xf32>, vector<8x256xf32>, vector<8x256xf32>, vector<8x256xf32>, vector<8x256xf32>, vector<8x256xf32>, vector<8x256xf32>, vector<8x256xf32> -> vector<72x256xf32>
    %197 = arith.truncf %196 : vector<72x256xf32> to vector<72x256xbf16>
    %cst_154 = arith.constant dense<0.000000e+00> : vector<8x256xf32>
    %198 = tpu.matmul %1, %197, %cst_154 {dimension_numbers = #tpu.dot_dimension_numbers<[1], [0], [0], [1], [0, 0, 1, 1], [], []>} : vector<8x72xbf16>, vector<72x256xbf16>, vector<8x256xf32> -> vector<8x256xf32>
    %199 = vector.broadcast %3 : vector<8x1xf32> to vector<8x256xf32>
    %200 = arith.addf %198, %199 : vector<8x256xf32>
    %201 = arith.index_cast %c2_i32 : i32 to index
    %c0_155 = arith.constant 0 : index
    %c0_156 = arith.constant 0 : index
    %202 = vector.load %arg7[%201, %c0_155, %c0_156] : memref<4x8x256xf32, #tpu.memory_space<vmem>>, vector<1x8x256xf32>
    %203 = vector.shape_cast %202 : vector<1x8x256xf32> to vector<8x256xf32>
    %204 = vector.shape_cast %200 : vector<8x256xf32> to vector<1x8x256xf32>
    tpu.vector_store %arg7[%201, %c0_155, %c0_156], %204 {strides = array<i32>} : memref<4x8x256xf32, #tpu.memory_space<vmem>>, vector<1x8x256xf32>,
    %c3_i32 = arith.constant 3 : i32
    %205 = arith.index_cast %c3_i32 : i32 to index
    %c0_157 = arith.constant 0 : index
    %c0_158 = arith.constant 0 : index
    %206 = vector.load %arg1[%205, %c0_157, %c0_158] : memref<4x8x256xf32, #tpu.memory_space<vmem>>, vector<1x8x256xf32>
    %207 = vector.shape_cast %206 : vector<1x8x256xf32> to vector<8x256xf32>
    %c17_i32_159 = arith.constant 17 : i32
    %208 = tpu.dynamic_rotate %207 by %c17_i32_159 dim 1 : vector<8x256xf32>, i32 -> vector<8x256xf32>
    %c0_160 = arith.constant 0 : index
    %c0_161 = arith.constant 0 : index
    %209 = vector.load %arg6[%c0_160, %c0_161] : memref<72x256xf32, #tpu.memory_space<vmem>>, vector<8x256xf32>
    %210 = arith.mulf %209, %208 : vector<8x256xf32>
    %c16_i32_162 = arith.constant 16 : i32
    %211 = tpu.dynamic_rotate %207 by %c16_i32_162 dim 1 : vector<8x256xf32>, i32 -> vector<8x256xf32>
    %c8_163 = arith.constant 8 : index
    %c0_164 = arith.constant 0 : index
    %212 = vector.load %arg6[%c8_163, %c0_164] : memref<72x256xf32, #tpu.memory_space<vmem>>, vector<8x256xf32>
    %213 = arith.mulf %212, %211 : vector<8x256xf32>
    %c15_i32_165 = arith.constant 15 : i32
    %214 = tpu.dynamic_rotate %207 by %c15_i32_165 dim 1 : vector<8x256xf32>, i32 -> vector<8x256xf32>
    %c16_166 = arith.constant 16 : index
    %c0_167 = arith.constant 0 : index
    %215 = vector.load %arg6[%c16_166, %c0_167] : memref<72x256xf32, #tpu.memory_space<vmem>>, vector<8x256xf32>
    %216 = arith.mulf %215, %214 : vector<8x256xf32>
    %c1_i32_168 = arith.constant 1 : i32
    %217 = tpu.dynamic_rotate %207 by %c1_i32_168 dim 1 : vector<8x256xf32>, i32 -> vector<8x256xf32>
    %c24_169 = arith.constant 24 : index
    %c0_170 = arith.constant 0 : index
    %218 = vector.load %arg6[%c24_169, %c0_170] : memref<72x256xf32, #tpu.memory_space<vmem>>, vector<8x256xf32>
    %219 = arith.mulf %218, %217 : vector<8x256xf32>
    %c255_i32_171 = arith.constant 255 : i32
    %220 = tpu.dynamic_rotate %207 by %c255_i32_171 dim 1 : vector<8x256xf32>, i32 -> vector<8x256xf32>
    %c40_172 = arith.constant 40 : index
    %c0_173 = arith.constant 0 : index
    %221 = vector.load %arg6[%c40_172, %c0_173] : memref<72x256xf32, #tpu.memory_space<vmem>>, vector<8x256xf32>
    %222 = arith.mulf %221, %220 : vector<8x256xf32>
    %c241_i32_174 = arith.constant 241 : i32
    %223 = tpu.dynamic_rotate %207 by %c241_i32_174 dim 1 : vector<8x256xf32>, i32 -> vector<8x256xf32>
    %c48_175 = arith.constant 48 : index
    %c0_176 = arith.constant 0 : index
    %224 = vector.load %arg6[%c48_175, %c0_176] : memref<72x256xf32, #tpu.memory_space<vmem>>, vector<8x256xf32>
    %225 = arith.mulf %224, %223 : vector<8x256xf32>
    %c240_i32_177 = arith.constant 240 : i32
    %226 = tpu.dynamic_rotate %207 by %c240_i32_177 dim 1 : vector<8x256xf32>, i32 -> vector<8x256xf32>
    %c56_178 = arith.constant 56 : index
    %c0_179 = arith.constant 0 : index
    %227 = vector.load %arg6[%c56_178, %c0_179] : memref<72x256xf32, #tpu.memory_space<vmem>>, vector<8x256xf32>
    %228 = arith.mulf %227, %226 : vector<8x256xf32>
    %c239_i32_180 = arith.constant 239 : i32
    %229 = tpu.dynamic_rotate %207 by %c239_i32_180 dim 1 : vector<8x256xf32>, i32 -> vector<8x256xf32>
    %c64_181 = arith.constant 64 : index
    %c0_182 = arith.constant 0 : index
    %230 = vector.load %arg6[%c64_181, %c0_182] : memref<72x256xf32, #tpu.memory_space<vmem>>, vector<8x256xf32>
    %231 = arith.mulf %230, %229 : vector<8x256xf32>
    %232 = tpu.concatenate %210, %213, %216, %219, %207, %222, %225, %228, %231 in 0 : vector<8x256xf32>, vector<8x256xf32>, vector<8x256xf32>, vector<8x256xf32>, vector<8x256xf32>, vector<8x256xf32>, vector<8x256xf32>, vector<8x256xf32>, vector<8x256xf32> -> vector<72x256xf32>
    %233 = arith.truncf %232 : vector<72x256xf32> to vector<72x256xbf16>
    %cst_183 = arith.constant dense<0.000000e+00> : vector<8x256xf32>
    %234 = tpu.matmul %0, %233, %cst_183 {dimension_numbers = #tpu.dot_dimension_numbers<[1], [0], [0], [1], [0, 0, 1, 1], [], []>} : vector<8x72xbf16>, vector<72x256xbf16>, vector<8x256xf32> -> vector<8x256xf32>
    %235 = vector.broadcast %2 : vector<8x1xf32> to vector<8x256xf32>
    %236 = arith.addf %234, %235 : vector<8x256xf32>
    %cst_184 = arith.constant 0.000000e+00 : f32
    %237 = vector.broadcast %cst_184 : f32 to vector<8x256xf32>
    %238 = arith.maximumf %236, %237 : vector<8x256xf32>
    %c17_i32_185 = arith.constant 17 : i32
    %239 = tpu.dynamic_rotate %238 by %c17_i32_185 dim 1 : vector<8x256xf32>, i32 -> vector<8x256xf32>
    %c0_186 = arith.constant 0 : index
    %c0_187 = arith.constant 0 : index
    %240 = vector.load %arg6[%c0_186, %c0_187] : memref<72x256xf32, #tpu.memory_space<vmem>>, vector<8x256xf32>
    %241 = arith.mulf %240, %239 : vector<8x256xf32>
    %c16_i32_188 = arith.constant 16 : i32
    %242 = tpu.dynamic_rotate %238 by %c16_i32_188 dim 1 : vector<8x256xf32>, i32 -> vector<8x256xf32>
    %c8_189 = arith.constant 8 : index
    %c0_190 = arith.constant 0 : index
    %243 = vector.load %arg6[%c8_189, %c0_190] : memref<72x256xf32, #tpu.memory_space<vmem>>, vector<8x256xf32>
    %244 = arith.mulf %243, %242 : vector<8x256xf32>
    %c15_i32_191 = arith.constant 15 : i32
    %245 = tpu.dynamic_rotate %238 by %c15_i32_191 dim 1 : vector<8x256xf32>, i32 -> vector<8x256xf32>
    %c16_192 = arith.constant 16 : index
    %c0_193 = arith.constant 0 : index
    %246 = vector.load %arg6[%c16_192, %c0_193] : memref<72x256xf32, #tpu.memory_space<vmem>>, vector<8x256xf32>
    %247 = arith.mulf %246, %245 : vector<8x256xf32>
    %c1_i32_194 = arith.constant 1 : i32
    %248 = tpu.dynamic_rotate %238 by %c1_i32_194 dim 1 : vector<8x256xf32>, i32 -> vector<8x256xf32>
    %c24_195 = arith.constant 24 : index
    %c0_196 = arith.constant 0 : index
    %249 = vector.load %arg6[%c24_195, %c0_196] : memref<72x256xf32, #tpu.memory_space<vmem>>, vector<8x256xf32>
    %250 = arith.mulf %249, %248 : vector<8x256xf32>
    %c255_i32_197 = arith.constant 255 : i32
    %251 = tpu.dynamic_rotate %238 by %c255_i32_197 dim 1 : vector<8x256xf32>, i32 -> vector<8x256xf32>
    %c40_198 = arith.constant 40 : index
    %c0_199 = arith.constant 0 : index
    %252 = vector.load %arg6[%c40_198, %c0_199] : memref<72x256xf32, #tpu.memory_space<vmem>>, vector<8x256xf32>
    %253 = arith.mulf %252, %251 : vector<8x256xf32>
    %c241_i32_200 = arith.constant 241 : i32
    %254 = tpu.dynamic_rotate %238 by %c241_i32_200 dim 1 : vector<8x256xf32>, i32 -> vector<8x256xf32>
    %c48_201 = arith.constant 48 : index
    %c0_202 = arith.constant 0 : index
    %255 = vector.load %arg6[%c48_201, %c0_202] : memref<72x256xf32, #tpu.memory_space<vmem>>, vector<8x256xf32>
    %256 = arith.mulf %255, %254 : vector<8x256xf32>
    %c240_i32_203 = arith.constant 240 : i32
    %257 = tpu.dynamic_rotate %238 by %c240_i32_203 dim 1 : vector<8x256xf32>, i32 -> vector<8x256xf32>
    %c56_204 = arith.constant 56 : index
    %c0_205 = arith.constant 0 : index
    %258 = vector.load %arg6[%c56_204, %c0_205] : memref<72x256xf32, #tpu.memory_space<vmem>>, vector<8x256xf32>
    %259 = arith.mulf %258, %257 : vector<8x256xf32>
    %c239_i32_206 = arith.constant 239 : i32
    %260 = tpu.dynamic_rotate %238 by %c239_i32_206 dim 1 : vector<8x256xf32>, i32 -> vector<8x256xf32>
    %c64_207 = arith.constant 64 : index
    %c0_208 = arith.constant 0 : index
    %261 = vector.load %arg6[%c64_207, %c0_208] : memref<72x256xf32, #tpu.memory_space<vmem>>, vector<8x256xf32>
    %262 = arith.mulf %261, %260 : vector<8x256xf32>
    %263 = tpu.concatenate %241, %244, %247, %250, %238, %253, %256, %259, %262 in 0 : vector<8x256xf32>, vector<8x256xf32>, vector<8x256xf32>, vector<8x256xf32>, vector<8x256xf32>, vector<8x256xf32>, vector<8x256xf32>, vector<8x256xf32>, vector<8x256xf32> -> vector<72x256xf32>
    %264 = arith.truncf %263 : vector<72x256xf32> to vector<72x256xbf16>
    %cst_209 = arith.constant dense<0.000000e+00> : vector<8x256xf32>
    %265 = tpu.matmul %1, %264, %cst_209 {dimension_numbers = #tpu.dot_dimension_numbers<[1], [0], [0], [1], [0, 0, 1, 1], [], []>} : vector<8x72xbf16>, vector<72x256xbf16>, vector<8x256xf32> -> vector<8x256xf32>
    %266 = vector.broadcast %3 : vector<8x1xf32> to vector<8x256xf32>
    %267 = arith.addf %265, %266 : vector<8x256xf32>
    %268 = arith.index_cast %c3_i32 : i32 to index
    %c0_210 = arith.constant 0 : index
    %c0_211 = arith.constant 0 : index
    %269 = vector.load %arg7[%268, %c0_210, %c0_211] : memref<4x8x256xf32, #tpu.memory_space<vmem>>, vector<1x8x256xf32>
    %270 = vector.shape_cast %269 : vector<1x8x256xf32> to vector<8x256xf32>
    %271 = vector.shape_cast %267 : vector<8x256xf32> to vector<1x8x256xf32>
    tpu.vector_store %arg7[%268, %c0_210, %c0_211], %271 {strides = array<i32>} : memref<4x8x256xf32, #tpu.memory_space<vmem>>, vector<1x8x256xf32>,
    %c4_i32 = arith.constant 4 : i32
    return
  }
  func.func @transform_0(%arg0: i32) -> (i32, i32, i32) {
    %c0_i32 = arith.constant 0 : i32
    %c0_i32_0 = arith.constant 0 : i32
    %c0_i32_1 = arith.constant 0 : i32
    return %arg0, %c0_i32, %c0_i32_0 : i32, i32, i32
  }
  func.func @transform_1(%arg0: i32) -> (i32, i32) {
    %c0_i32 = arith.constant 0 : i32
    %c0_i32_0 = arith.constant 0 : i32
    %c0_i32_1 = arith.constant 0 : i32
    return %c0_i32, %c0_i32_0 : i32, i32
  }
  func.func @transform_2(%arg0: i32) -> (i32, i32) {
    %c0_i32 = arith.constant 0 : i32
    %c0_i32_0 = arith.constant 0 : i32
    %c0_i32_1 = arith.constant 0 : i32
    return %c0_i32, %c0_i32_0 : i32, i32
  }
  func.func @transform_3(%arg0: i32) -> (i32, i32) {
    %c0_i32 = arith.constant 0 : i32
    %c0_i32_0 = arith.constant 0 : i32
    %c0_i32_1 = arith.constant 0 : i32
    return %c0_i32, %c0_i32_0 : i32, i32
  }
  func.func @transform_4(%arg0: i32) -> (i32, i32) {
    %c0_i32 = arith.constant 0 : i32
    %c0_i32_0 = arith.constant 0 : i32
    %c0_i32_1 = arith.constant 0 : i32
    return %c0_i32, %c0_i32_0 : i32, i32
  }
  func.func @transform_5(%arg0: i32) -> (i32, i32) {
    %c0_i32 = arith.constant 0 : i32
    %c0_i32_0 = arith.constant 0 : i32
    %c0_i32_1 = arith.constant 0 : i32
    return %c0_i32, %c0_i32_0 : i32, i32
  }
  func.func @transform_6(%arg0: i32) -> (i32, i32, i32) {
    %c0_i32 = arith.constant 0 : i32
    %c0_i32_0 = arith.constant 0 : i32
    %c0_i32_1 = arith.constant 0 : i32
    return %arg0, %c0_i32, %c0_i32_0 : i32, i32, i32
  }
}

</mosaic_0001>

<bundles_post_ra>
// kernel: tile.13
= control target key start
LH: loop header
LB: loop body
LE: loop exit
PB: predicated region body
PF: predicated region fallthrough
CT: control target
= control target key end

     0   :  { %2 = vsyncpa [#allocation1], 0  ;;  %s44_s6 = smov [#allocation0]   ;;  %s70_s0 = inlined_call_operand.hbm [shape: f32[4], index: 0, kind: input, shape index: {}]   ;;  %s71_s1 = inlined_call_operand.vmem [shape: f32[2,4], index: 1, kind: output, shape index: {}]  }
   0x1   :  { %s9_s7 = sshll.u32 %s44_s6, 4  ;;  %s20_s10 = scalar_lea.hbm %s70_s0, 16  ;;  %s10_s7 = int_to_ptr.vmem [resolvable:$true] %s9_s7 }
   0x2   :  { %p21_p0 = scmp.ne.s32.totalorder %s70_s0, %s20_s10  ;;  %p24_p1 = scmp.lt.u32.totalorder %s20_s10, %s70_s0 }
   0x4   :  { %p26_p2 = pnand %p24_p1, %p21_p0 }
   0x6   :  { %29 = shalt.err (!%p26_p2)
}
   0x7   :  { %s30_s15 = scalar_lea.vmem %s10_s7, 16  ;;  %s34_s16 = scalar_lea.vmem %s10_s7, 32 }
   0x8   :  { %p31_p3 = scmp.ne.s32.totalorder %s10_s7, %s30_s15  ;;  %p35_p4 = scmp.lt.s32.totalorder %s10_s7, %s10_s7 }
   0x9   :  { %p36_p5 = scmp.lt.s32.totalorder %s34_s16, %s30_s15 }
   0xb   :  { %p37_p6 = por %p36_p5, %p35_p4 }
   0xd   :  { %p38_p7 = pnand %p37_p6, %p31_p3 }
   0xf   :  { %41 = shalt.err (!%p38_p7)
}
  0x10   :  { %12 = dma.hbm_to_vmem [thread:$0]  %s70_s0, 16, %s10_s7, [#allocation1]  }
  0x11   :  { %42 = dma.done.wait [#allocation1], 16  }
  0x12   :  { %43 = vsyncadd [#allocation1], 4294967280  ;;  %v16_v0 = vld [vmem:[#allocation0] ss:$0 sm:$0xff] }
  0x13   :  { %17 = vst [vmem:[%s71_s1] sm:$0x3] %v16_v0 }
  0x14   :  { %18 = vsyncpa [#allocation1], 1 }

// kernel: tile.1
= control target key start
LH: loop header
LB: loop body
LE: loop exit
PB: predicated region body
PF: predicated region fallthrough
CT: control target
= control target key end

     0   :  { %s34_s8 = smov 125   ;;  %vm7_vm0 = vcmask 7168   ;;  %s35_s11 = smov 126   ;;  %s61_s0 = inlined_call_operand.vmem [shape: f32[2,4], index: 0, kind: input, shape index: {}]   ;;  %s62_s1 = inlined_call_operand.vmem [shape: f32[8,1], index: 1, kind: output, shape index: {}]  }
   0x1   :  { %v4_v0 = vld [vmem:[%s61_s0] sm:$0x3]  ;;  %s33_s0 = smov 127  }
   0x2   :  { %5 = vst [vmem:[#allocation0] sm:$0x3] %v4_v0 }
   0x9   :  { %v9_v1 = vld [vmem:[#allocation0] sm:$0x3]  }
   0xa   :  { %v21_v2 = vld [vmem:[#allocation0] sm:$0x3]   ;;  %10 = vrot.lane.b32.xlu0 %v9_v1, %s33_s0 }
   0xb   :  { %22 = vrot.lane.b32.xlu1 %v21_v2, %s34_s8  ;;  %v6_v3 = vld [vmem:[#allocation0] sm:$0x3]  }
   0xc   :  { %v15_v4 = vld [vmem:[#allocation0] sm:$0x3]   ;;  %8 = vst.msk [vmem:[%s62_s1] ss:$4 sm:$0x3] %vm7_vm0, %v6_v3  }
   0xe   :  { %16 = vrot.lane.b32.xlu0 %v15_v4, %s35_s11 }
  0x7c   :  { %v11_v5 = vpop.permute.xlu0 %10  }
  0x7d   :  { %v23_v6 = vpop.permute.xlu1 %22   ;;  %27 = vst.msk [vmem:[%s62_s1 + $0x1] ss:$4 sm:$0x3] %vm7_vm0, %v11_v5  }
  0x7e   :  { %29 = vst.msk [vmem:[%s62_s1 + $0x3] ss:$4 sm:$0x3] %vm7_vm0, %v23_v6  }
  0x80   :  { %v17_v7 = vpop.permute.xlu0 %16  }
  0x81   :  { %28 = vst.msk [vmem:[%s62_s1 + $0x2] ss:$4 sm:$0x3] %vm7_vm0, %v17_v7  }

// kernel: double_conv2d_channel_dim.1
= control target key start
LH: loop header
LB: loop body
LE: loop exit
PB: predicated region body
PF: predicated region fallthrough
CT: control target
= control target key end

     0   :  { %s1176_s23 = smov 16   ;;  %s1177_s24 = smov 17   ;;  %v1183_v2 = vmov 0   ;;  %v34_v9 = vlaneseq  ;;  %vm139_vm8 = vcmask 1043456   ;;  %vm135_vm9 = vcmask 588800   ;;  %s2193_s0 = inlined_call_operand.vmem [shape: f32[4,8,256], index: 0, kind: input, shape index: {}]   ;;  %s2194_s5 = inlined_call_operand.vmem [shape: f32[72,256], index: 5, kind: input, shape index: {}]   ;;  %s2195_s2 = inlined_call_operand.vmem [shape: f32[8,1], index: 2, kind: input, shape index: {}]   ;;  %s2196_s1 = inlined_call_operand.vmem [shape: bf16[8,72], index: 1, kind: input, shape index: {}]   ;;  %s2197_s4 = inlined_call_operand.vmem [shape: f32[8,1], index: 4, kind: input, shape index: {}]   ;;  %s2198_s3 = inlined_call_operand.vmem [shape: bf16[8,72], index: 3, kind: input, shape index: {}]   ;;  %s2199_s6 = inlined_call_operand.vmem [shape: f32[4,8,256], index: 6, kind: output, shape index: {}]  }
   0x1   :  { %v1223_v0 = vld [vmem:[%s2193_s0] sm:$0xff]  ;;  %v1232_v1 = vld [vmem:[%s2193_s0 + $0x8] sm:$0xff]  ;;  %s1178_s27 = smov 15   ;;  %s1179_s28 = smov 1   ;;  %178 = vmatprep.mubr.bf16.mxu0 %v1183_v2  ;;  %1159 = vset.pattern.permute.xlu0 %v1183_v2  ;;  %v1268_v3 = vld [vmem:[%s2193_s0 + $0x18] sm:$0xff] }
   0x2   :  { %43 = vrot.lane.b32.xlu1 %v1223_v0, %s1176_s23  ;;  %30 = vrot.lane.b32.xlu0 %v1223_v0, %s1177_s24  ;;  %s1180_s29 = smov 127   ;;  %s1181_s30 = smov 113   ;;  %v1273_v4 = vld [vmem:[%s2193_s0 + $0x10] sm:$0xff]  ;;  %v1310_v5 = vld [vmem:[%s2193_s0 + $0x28] sm:$0xff]  ;;  %v1379_v10 = vand.u32 127, %v34_v9 }
   0x3   :  { %s1182_s7 = smov 112   ;;  %309 = vmatprep.mubr.bf16.mxu1 %v1183_v2  ;;  %s1184_s8 = smov 111   ;;  %v1315_v6 = vld [vmem:[%s2193_s0 + $0x20] sm:$0xff]  ;;  %v1352_v7 = vld [vmem:[%s2193_s0 + $0x38] sm:$0xff]  ;;  %v1357_v8 = vld [vmem:[%s2193_s0 + $0x30] sm:$0xff] }
   0x4   :  { %vm47_vm0 = vcmp.lt.s32.totalorder %v1379_v10, 16  ;;  %vm36_vm1 = vcmp.lt.s32.totalorder %v1379_v10, 17  ;;  %v1390_v13 = vld [vmem:[%s2194_s5 + $0x8] sm:$0xff]  ;;  %v1395_v14 = vld [vmem:[%s2194_s5 + $0x18] sm:$0xff]  ;;  %v1400_v15 = vld [vmem:[%s2194_s5] sm:$0xff]  ;;  %vm58_vm2 = vcmp.lt.s32.totalorder %v1379_v10, 15 }
   0x5   :  { %v1405_v18 = vld [vmem:[%s2194_s5 + $0x10] sm:$0xff]  ;;  %v1427_v31 = vld [vmem:[%s2194_s5 + $0x20] sm:$0xff]  ;;  %v1432_v32 = vld [vmem:[%s2194_s5 + $0x28] sm:$0xff]  ;;  %vm69_vm3 = vcmp.lt.s32.totalorder %v1379_v10, 1  ;;  %vm80_vm4 = vcmp.lt.s32.totalorder %v1379_v10, 127  ;;  %vm91_vm5 = vcmp.lt.s32.totalorder %v1379_v10, 113 }
   0x6   :  { %45 = vrot.lane.b32.xlu1 %v1232_v1, %s1176_s23  ;;  %32 = vrot.lane.b32.xlu0 %v1232_v1, %s1177_s24  ;;  %v1446_v35 = vld [vmem:[%s2194_s5 + $0x30] sm:$0xff]  ;;  %v1451_v36 = vld [vmem:[%s2194_s5 + $0x38] sm:$0xff]  ;;  %vm102_vm6 = vcmp.lt.s32.totalorder %v1379_v10, 112  ;;  %vm113_vm7 = vcmp.lt.s32.totalorder %v1379_v10, 111 }
   0x7   :  { %v26_v37 = vld [vmem:[%s2195_s2] sm:$0xff]  ;;  %v1468_v46 = vld [vmem:[%s2194_s5 + $0x50] sm:$0xff]  ;;  %v1473_v47 = vld [vmem:[%s2194_s5 + $0x58] sm:$0xff] }
   0x8   :  { %v1487_v60 = vld [vmem:[%s2194_s5 + $0x60] sm:$0xff]  ;;  %v1493_v61 = vld [vmem:[%s2194_s5 + $0x68] sm:$0xff] }
   0xa   :  { %56 = vrot.lane.b32.xlu1 %v1232_v1, %s1178_s27  ;;  %54 = vrot.lane.b32.xlu0 %v1223_v0, %s1178_s27 }
   0xe   :  { %67 = vrot.lane.b32.xlu1 %v1232_v1, %s1179_s28  ;;  %65 = vrot.lane.b32.xlu0 %v1223_v0, %s1179_s28 }
  0x12   :  { %78 = vrot.lane.b32.xlu1 %v1232_v1, %s1180_s29  ;;  %76 = vrot.lane.b32.xlu0 %v1223_v0, %s1180_s29 }
  0x16   :  { %89 = vrot.lane.b32.xlu1 %v1232_v1, %s1181_s30  ;;  %87 = vrot.lane.b32.xlu0 %v1223_v0, %s1181_s30 }
  0x1a   :  { %100 = vrot.lane.b32.xlu1 %v1232_v1, %s1182_s7  ;;  %98 = vrot.lane.b32.xlu0 %v1223_v0, %s1182_s7 }
  0x1e   :  { %111 = vrot.lane.b32.xlu1 %v1232_v1, %s1184_s8  ;;  %109 = vrot.lane.b32.xlu0 %v1223_v0, %s1184_s8 }
  0x22   :  { %325 = vrot.lane.b32.xlu1 %v1268_v3, %s1177_s24  ;;  %323 = vrot.lane.b32.xlu0 %v1273_v4, %s1177_s24 }
  0x26   :  { %335 = vrot.lane.b32.xlu1 %v1268_v3, %s1176_s23  ;;  %333 = vrot.lane.b32.xlu0 %v1273_v4, %s1176_s23 }
  0x2a   :  { %345 = vrot.lane.b32.xlu1 %v1268_v3, %s1178_s27  ;;  %343 = vrot.lane.b32.xlu0 %v1273_v4, %s1178_s27 }
  0x2e   :  { %355 = vrot.lane.b32.xlu1 %v1268_v3, %s1179_s28  ;;  %353 = vrot.lane.b32.xlu0 %v1273_v4, %s1179_s28 }
  0x32   :  { %365 = vrot.lane.b32.xlu1 %v1268_v3, %s1180_s29  ;;  %363 = vrot.lane.b32.xlu0 %v1273_v4, %s1180_s29 }
  0x36   :  { %375 = vrot.lane.b32.xlu1 %v1268_v3, %s1181_s30  ;;  %373 = vrot.lane.b32.xlu0 %v1273_v4, %s1181_s30 }
  0x3a   :  { %385 = vrot.lane.b32.xlu1 %v1268_v3, %s1182_s7  ;;  %383 = vrot.lane.b32.xlu0 %v1273_v4, %s1182_s7 }
  0x3e   :  { %395 = vrot.lane.b32.xlu1 %v1268_v3, %s1184_s8  ;;  %393 = vrot.lane.b32.xlu0 %v1273_v4, %s1184_s8 }
  0x42   :  { %591 = vrot.lane.b32.xlu1 %v1310_v5, %s1177_s24  ;;  %589 = vrot.lane.b32.xlu0 %v1315_v6, %s1177_s24 }
  0x46   :  { %601 = vrot.lane.b32.xlu1 %v1310_v5, %s1176_s23  ;;  %599 = vrot.lane.b32.xlu0 %v1315_v6, %s1176_s23 }
  0x4a   :  { %611 = vrot.lane.b32.xlu1 %v1310_v5, %s1178_s27  ;;  %609 = vrot.lane.b32.xlu0 %v1315_v6, %s1178_s27 }
  0x4e   :  { %621 = vrot.lane.b32.xlu1 %v1310_v5, %s1179_s28  ;;  %619 = vrot.lane.b32.xlu0 %v1315_v6, %s1179_s28 }
  0x52   :  { %631 = vrot.lane.b32.xlu1 %v1310_v5, %s1180_s29  ;;  %629 = vrot.lane.b32.xlu0 %v1315_v6, %s1180_s29 }
  0x56   :  { %641 = vrot.lane.b32.xlu1 %v1310_v5, %s1181_s30  ;;  %639 = vrot.lane.b32.xlu0 %v1315_v6, %s1181_s30 }
  0x5a   :  { %651 = vrot.lane.b32.xlu1 %v1310_v5, %s1182_s7  ;;  %649 = vrot.lane.b32.xlu0 %v1315_v6, %s1182_s7 }
  0x5e   :  { %661 = vrot.lane.b32.xlu1 %v1310_v5, %s1184_s8  ;;  %659 = vrot.lane.b32.xlu0 %v1315_v6, %s1184_s8 }
  0x62   :  { %857 = vrot.lane.b32.xlu1 %v1352_v7, %s1177_s24  ;;  %855 = vrot.lane.b32.xlu0 %v1357_v8, %s1177_s24 }
  0x66   :  { %867 = vrot.lane.b32.xlu1 %v1352_v7, %s1176_s23  ;;  %865 = vrot.lane.b32.xlu0 %v1357_v8, %s1176_s23 }
  0x6a   :  { %877 = vrot.lane.b32.xlu1 %v1352_v7, %s1178_s27  ;;  %875 = vrot.lane.b32.xlu0 %v1357_v8, %s1178_s27 }
  0x6e   :  { %887 = vrot.lane.b32.xlu1 %v1352_v7, %s1179_s28  ;;  %885 = vrot.lane.b32.xlu0 %v1357_v8, %s1179_s28 }
  0x72   :  { %897 = vrot.lane.b32.xlu1 %v1352_v7, %s1180_s29  ;;  %895 = vrot.lane.b32.xlu0 %v1357_v8, %s1180_s29 }
  0x74   :  { %v44_v11 = vpop.permute.xlu1 %43  ;;  %v31_v12 = vpop.permute.xlu0 %30 }
  0x76   :  { %907 = vrot.lane.b32.xlu1 %v1352_v7, %s1181_s30  ;;  %905 = vrot.lane.b32.xlu0 %v1357_v8, %s1181_s30 }
  0x78   :  { %v46_v16 = vpop.permute.xlu1 %45  ;;  %v33_v17 = vpop.permute.xlu0 %32 }
  0x79   :  { %v49_v19 = vsel %vm47_vm0, %v46_v16, %v44_v11  ;;  %v38_v20 = vsel %vm36_vm1, %v33_v17, %v31_v12  ;;  %v37_v21 = vsel %vm36_vm1, %v31_v12, %v33_v17  ;;  %v48_v22 = vsel %vm47_vm0, %v44_v11, %v46_v16 }
  0x7a   :  { %917 = vrot.lane.b32.xlu1 %v1352_v7, %s1182_s7  ;;  %915 = vrot.lane.b32.xlu0 %v1357_v8, %s1182_s7  ;;  %v42_v23 = vmul.f32 %v1390_v13, %v37_v21  ;;  %v53_v24 = vmul.f32 %v1395_v14, %v48_v22  ;;  %v41_v25 = vmul.f32 %v1400_v15, %v38_v20  ;;  %v1521_v22 = vld [vmem:[%s2194_s5 + $0x88] sm:$0xff] }
  0x7b   :  { %v52_v26 = vmul.f32 %v1405_v18, %v49_v19 }
  0x7c   :  { %v57_v27 = vpop.permute.xlu1 %56  ;;  %v55_v28 = vpop.permute.xlu0 %54  ;;  %v121_v29 = vpack.c.bf16 %v53_v24, %v42_v23  ;;  %v1526_v23 = vld [vmem:[%s2194_s5 + $0x80] sm:$0xff] }
  0x7d   :  { %v120_v30 = vpack.c.bf16 %v52_v26, %v41_v25  ;;  %v59_v33 = vsel %vm58_vm2, %v55_v28, %v57_v27  ;;  %v60_v34 = vsel %vm58_vm2, %v57_v27, %v55_v28 }
  0x7e   :  { %927 = vrot.lane.b32.xlu1 %v1352_v7, %s1184_s8  ;;  %925 = vrot.lane.b32.xlu0 %v1357_v8, %s1184_s8  ;;  %v63_v42 = vmul.f32 %v1427_v31, %v60_v34  ;;  %v64_v43 = vmul.f32 %v1432_v32, %v59_v33 }
  0x7f   :  { %146 = vmatprep.subr.bf16.mxu0 %v121_v29 }
  0x80   :  { %147 = vmatpush1.bf16.msra.mxu0 %v120_v30  ;;  %v68_v38 = vpop.permute.xlu1 %67  ;;  %v66_v39 = vpop.permute.xlu0 %65 }
  0x81   :  { %v70_v40 = vsel %vm69_vm3, %v66_v39, %v68_v38  ;;  %v71_v41 = vsel %vm69_vm3, %v68_v38, %v66_v39 }
  0x82   :  { %v74_v44 = vmul.f32 %v1446_v35, %v71_v41  ;;  %v75_v45 = vmul.f32 %v1451_v36, %v70_v40  ;;  %132 = vperm.xlu0 %1159, %v26_v37  }
  0x84   :  { %v79_v48 = vpop.permute.xlu1 %78  ;;  %v77_v49 = vpop.permute.xlu0 %76  ;;  %v123_v50 = vpack.c.bf16 %v75_v45, %v64_v43  ;;  %v122_v51 = vpack.c.bf16 %v74_v44, %v63_v42  ;;  %v1543_v43 = vld [vmem:[%s2196_s1] sm:$0xf] }
  0x85   :  { %v81_v52 = vsel %vm80_vm4, %v77_v49, %v79_v48  ;;  %v82_v53 = vsel %vm80_vm4, %v79_v48, %v77_v49 }
  0x86   :  { %v85_v54 = vmul.f32 %v1468_v46, %v81_v52  ;;  %v86_v55 = vmul.f32 %v1473_v47, %v82_v53  ;;  %148 = vmatprep.subr.bf16.mxu0 %v123_v50 }
  0x87   :  { %149 = vmatpush1.bf16.msra.mxu0 %v122_v51 }
  0x88   :  { %v90_v56 = vpop.permute.xlu1 %89  ;;  %v88_v57 = vpop.permute.xlu0 %87  ;;  %v125_v58 = vpack.c.bf16 %v86_v55, %v1232_v1  ;;  %v124_v59 = vpack.c.bf16 %v85_v54, %v1223_v0  ;;  %v1502_v0 = vld [vmem:[%s2194_s5 + $0x70] sm:$0xff]  ;;  %v1507_v1 = vld [vmem:[%s2194_s5 + $0x78] sm:$0xff] }
  0x89   :  { %v92_v62 = vsel %vm91_vm5, %v88_v57, %v90_v56  ;;  %v93_v63 = vsel %vm91_vm5, %v90_v56, %v88_v57 }
  0x8a   :  { %150 = vmatprep.subr.bf16.mxu0 %v125_v58  ;;  %v96_v17 = vmul.f32 %v1487_v60, %v92_v62  ;;  %v97_v19 = vmul.f32 %v1493_v61, %v93_v63 }
  0x8b   :  { %151 = vmatpush1.bf16.msra.mxu0 %v124_v59 }
  0x8c   :  { %v101_v9 = vpop.permute.xlu1 %100  ;;  %v99_v11 = vpop.permute.xlu0 %98 }
  0x8d   :  { %v103_v12 = vsel %vm102_vm6, %v99_v11, %v101_v9  ;;  %v104_v16 = vsel %vm102_vm6, %v101_v9, %v99_v11 }
  0x8e   :  { %v107_v20 = vmul.f32 %v1502_v0, %v103_v12  ;;  %v108_v21 = vmul.f32 %v1507_v1, %v104_v16 }
  0x90   :  { %v112_v24 = vpop.permute.xlu1 %111  ;;  %v110_v25 = vpop.permute.xlu0 %109  ;;  %v127_v26 = vpack.c.bf16 %v108_v21, %v97_v19  ;;  %v126_v27 = vpack.c.bf16 %v107_v20, %v96_v17 }
  0x91   :  { %v114_v28 = vsel %vm113_vm7, %v110_v25, %v112_v24  ;;  %v115_v29 = vsel %vm113_vm7, %v112_v24, %v110_v25 }
  0x92   :  { %v119_v30 = vmul.f32 %v1521_v22, %v115_v29  ;;  %152 = vmatprep.subr.bf16.mxu0 %v127_v26  ;;  %v118_v33 = vmul.f32 %v1526_v23, %v114_v28 }
  0x93   :  { %153 = vmatpush1.bf16.msra.mxu0 %v126_v27 }
  0x94   :  { %v129_v34 = vpack.c.bf16 %v119_v30, %v119_v30  ;;  %v326_v37 = vpop.permute.xlu1 %325  ;;  %v324_v38 = vpop.permute.xlu0 %323  ;;  %v128_v39 = vpack.c.bf16 %v118_v33, %v118_v33 }
  0x95   :  { %v327_v40 = vsel %vm36_vm1, %v324_v38, %v326_v37  ;;  %v328_v41 = vsel %vm36_vm1, %v326_v37, %v324_v38 }
  0x96   :  { %1122 = vmatprep.subr.msk.bf16.mxu0 %vm139_vm8, %v129_v34  ;;  %v141_v42 = vsel %vm139_vm8, %v128_v39, 0  ;;  %v331_v44 = vmul.f32 %v328_v41, %v1400_v15  ;;  %v332_v45 = vmul.f32 %v327_v40, %v1390_v13 }
  0x97   :  { %155 = vmatpush1.bf16.msra.mxu0 %v141_v42 }
  0x98   :  { %v336_v48 = vpop.permute.xlu1 %335  ;;  %v334_v49 = vpop.permute.xlu0 %333 }
  0x99   :  { %v337_v50 = vsel %vm47_vm0, %v334_v49, %v336_v48  ;;  %v338_v51 = vsel %vm47_vm0, %v336_v48, %v334_v49 }
  0x9a   :  { %v341_v52 = vmul.f32 %v338_v51, %v1405_v18  ;;  %v342_v53 = vmul.f32 %v337_v50, %v1395_v14  ;;  %1123 = vmatmul.mubr.msk.bf16.vlgmr.msra.gmra.mrb[0].mxu0 %vm135_vm9, %v1543_v43 }
  0x9b   :  { %451 = vmatprep.mubr.bf16.mxu0 %v1183_v2 }
  0x9c   :  { %v403_v54 = vpack.c.bf16 %v341_v52, %v331_v44  ;;  %v346_v55 = vpop.permute.xlu1 %345  ;;  %v344_v56 = vpop.permute.xlu0 %343  ;;  %v404_v57 = vpack.c.bf16 %v342_v53, %v332_v45 }
  0x9d   :  { %v347_v58 = vsel %vm58_vm2, %v344_v56, %v346_v55  ;;  %v348_v59 = vsel %vm58_vm2, %v346_v55, %v344_v56 }
  0x9e   :  { %419 = vmatprep.subr.bf16.mxu0 %v404_v57  ;;  %v351_v62 = vmul.f32 %v348_v59, %v1427_v31  ;;  %v352_v63 = vmul.f32 %v347_v58, %v1432_v32 }
  0x9f   :  { %420 = vmatpush1.bf16.msra.mxu0 %v403_v54 }
  0xa0   :  { %v356_v9 = vpop.permute.xlu1 %355  ;;  %v354_v11 = vpop.permute.xlu0 %353 }
  0xa1   :  { %v357_v12 = vsel %vm69_vm3, %v354_v11, %v356_v9  ;;  %v358_v16 = vsel %vm69_vm3, %v356_v9, %v354_v11 }
  0xa2   :  { %v361_v17 = vmul.f32 %v358_v16, %v1446_v35  ;;  %v362_v19 = vmul.f32 %v357_v12, %v1451_v36 }
  0xa4   :  { %v405_v20 = vpack.c.bf16 %v361_v17, %v351_v62  ;;  %v366_v21 = vpop.permute.xlu1 %365  ;;  %v364_v24 = vpop.permute.xlu0 %363  ;;  %v406_v25 = vpack.c.bf16 %v362_v19, %v352_v63 }
  0xa5   :  { %v367_v26 = vsel %vm80_vm4, %v364_v24, %v366_v21  ;;  %v368_v27 = vsel %vm80_vm4, %v366_v21, %v364_v24 }
  0xa6   :  { %v371_v28 = vmul.f32 %v367_v26, %v1468_v46  ;;  %v372_v29 = vmul.f32 %v368_v27, %v1473_v47  ;;  %421 = vmatprep.subr.bf16.mxu0 %v406_v25 }
  0xa7   :  { %422 = vmatpush1.bf16.msra.mxu0 %v405_v20 }
  0xa8   :  { %v407_v30 = vpack.c.bf16 %v371_v28, %v1273_v4  ;;  %v376_v33 = vpop.permute.xlu1 %375  ;;  %v374_v34 = vpop.permute.xlu0 %373  ;;  %v408_v37 = vpack.c.bf16 %v372_v29, %v1268_v3 }
  0xa9   :  { %v377_v38 = vsel %vm91_vm5, %v374_v34, %v376_v33  ;;  %v378_v39 = vsel %vm91_vm5, %v376_v33, %v374_v34 }
  0xaa   :  { %423 = vmatprep.subr.bf16.mxu0 %v408_v37  ;;  %v381_v40 = vmul.f32 %v377_v38, %v1487_v60  ;;  %v382_v41 = vmul.f32 %v378_v39, %v1493_v61 }
  0xab   :  { %424 = vmatpush1.bf16.msra.mxu0 %v407_v30 }
  0xac   :  { %v386_v42 = vpop.permute.xlu1 %385  ;;  %v384_v44 = vpop.permute.xlu0 %383 }
  0xad   :  { %v387_v4 = vsel %vm102_vm6, %v384_v44, %v386_v42  ;;  %v388_v3 = vsel %vm102_vm6, %v386_v42, %v384_v44 }
  0xae   :  { %v391_v45 = vmul.f32 %v387_v4, %v1502_v0  ;;  %v392_v48 = vmul.f32 %v388_v3, %v1507_v1 }
  0xb0   :  { %v409_v49 = vpack.c.bf16 %v391_v45, %v381_v40  ;;  %v396_v50 = vpop.permute.xlu1 %395  ;;  %v394_v51 = vpop.permute.xlu0 %393  ;;  %v410_v52 = vpack.c.bf16 %v392_v48, %v382_v41 }
  0xb1   :  { %v397_v53 = vsel %vm113_vm7, %v394_v51, %v396_v50  ;;  %v398_v54 = vsel %vm113_vm7, %v396_v50, %v394_v51 }
  0xb2   :  { %v401_v55 = vmul.f32 %v397_v53, %v1526_v23  ;;  %v402_v56 = vmul.f32 %v398_v54, %v1521_v22  ;;  %425 = vmatprep.subr.bf16.mxu0 %v410_v52 }
  0xb3   :  { %426 = vmatpush1.bf16.msra.mxu0 %v409_v49 }
  0xb4   :  { %v411_v57 = vpack.c.bf16 %v401_v55, %v401_v55  ;;  %v412_v58 = vpack.c.bf16 %v402_v56, %v402_v56  ;;  %v592_v59 = vpop.permute.xlu1 %591  ;;  %v590_v62 = vpop.permute.xlu0 %589 }
  0xb5   :  { %v593_v63 = vsel %vm36_vm1, %v590_v62, %v592_v59  ;;  %v594_v9 = vsel %vm36_vm1, %v592_v59, %v590_v62 }
  0xb6   :  { %1128 = vmatprep.subr.msk.bf16.mxu0 %vm139_vm8, %v412_v58  ;;  %v414_v11 = vsel %vm139_vm8, %v411_v57, 0  ;;  %v597_v12 = vmul.f32 %v594_v9, %v1400_v15  ;;  %v598_v16 = vmul.f32 %v593_v63, %v1390_v13 }
  0xb7   :  { %428 = vmatpush1.bf16.msra.mxu0 %v414_v11 }
  0xb8   :  { %v602_v17 = vpop.permute.xlu1 %601  ;;  %v600_v19 = vpop.permute.xlu0 %599 }
  0xb9   :  { %v603_v20 = vsel %vm47_vm0, %v600_v19, %v602_v17  ;;  %v604_v21 = vsel %vm47_vm0, %v602_v17, %v600_v19 }
  0xba   :  { %v607_v24 = vmul.f32 %v604_v21, %v1405_v18  ;;  %v608_v25 = vmul.f32 %v603_v20, %v1395_v14  ;;  %1129 = vmatmul.mubr.msk.bf16.vlgmr.msra.gmra.mrb[4].mxu0 %vm135_vm9, %v1543_v43 }
  0xbb   :  { %717 = vmatprep.mubr.bf16.mxu0 %v1183_v2 }
  0xbc   :  { %v669_v26 = vpack.c.bf16 %v607_v24, %v597_v12  ;;  %v612_v27 = vpop.permute.xlu1 %611  ;;  %v610_v28 = vpop.permute.xlu0 %609  ;;  %v670_v29 = vpack.c.bf16 %v608_v25, %v598_v16 }
  0xbd   :  { %v613_v30 = vsel %vm58_vm2, %v610_v28, %v612_v27  ;;  %v614_v33 = vsel %vm58_vm2, %v612_v27, %v610_v28 }
  0xbe   :  { %685 = vmatprep.subr.bf16.mxu0 %v670_v29  ;;  %v617_v34 = vmul.f32 %v614_v33, %v1427_v31  ;;  %v618_v37 = vmul.f32 %v613_v30, %v1432_v32 }
  0xbf   :  { %686 = vmatpush1.bf16.msra.mxu0 %v669_v26 }
  0xc0   :  { %v622_v38 = vpop.permute.xlu1 %621  ;;  %v620_v39 = vpop.permute.xlu0 %619 }
  0xc1   :  { %v623_v40 = vsel %vm69_vm3, %v620_v39, %v622_v38  ;;  %v624_v41 = vsel %vm69_vm3, %v622_v38, %v620_v39 }
  0xc2   :  { %v627_v42 = vmul.f32 %v624_v41, %v1446_v35  ;;  %v628_v44 = vmul.f32 %v623_v40, %v1451_v36 }
  0xc4   :  { %v671_v4 = vpack.c.bf16 %v627_v42, %v617_v34  ;;  %v632_v3 = vpop.permute.xlu1 %631  ;;  %v630_v45 = vpop.permute.xlu0 %629  ;;  %v672_v48 = vpack.c.bf16 %v628_v44, %v618_v37 }
  0xc5   :  { %v633_v49 = vsel %vm80_vm4, %v630_v45, %v632_v3  ;;  %v634_v50 = vsel %vm80_vm4, %v632_v3, %v630_v45 }
  0xc6   :  { %v637_v51 = vmul.f32 %v633_v49, %v1468_v46  ;;  %v638_v52 = vmul.f32 %v634_v50, %v1473_v47  ;;  %687 = vmatprep.subr.bf16.mxu0 %v672_v48 }
  0xc7   :  { %688 = vmatpush1.bf16.msra.mxu0 %v671_v4 }
  0xc8   :  { %v673_v53 = vpack.c.bf16 %v637_v51, %v1315_v6  ;;  %v642_v54 = vpop.permute.xlu1 %641  ;;  %v640_v55 = vpop.permute.xlu0 %639  ;;  %v674_v56 = vpack.c.bf16 %v638_v52, %v1310_v5 }
  0xc9   :  { %v643_v57 = vsel %vm91_vm5, %v640_v55, %v642_v54  ;;  %v644_v58 = vsel %vm91_vm5, %v642_v54, %v640_v55 }
  0xca   :  { %689 = vmatprep.subr.bf16.mxu0 %v674_v56  ;;  %v647_v59 = vmul.f32 %v643_v57, %v1487_v60  ;;  %v648_v62 = vmul.f32 %v644_v58, %v1493_v61 }
  0xcb   :  { %690 = vmatpush1.bf16.msra.mxu0 %v673_v53 }
  0xcc   :  { %v652_v63 = vpop.permute.xlu1 %651  ;;  %v650_v9 = vpop.permute.xlu0 %649 }
  0xcd   :  { %v653_v6 = vsel %vm102_vm6, %v650_v9, %v652_v63  ;;  %v654_v5 = vsel %vm102_vm6, %v652_v63, %v650_v9 }
  0xce   :  { %v657_v11 = vmul.f32 %v653_v6, %v1502_v0  ;;  %v658_v12 = vmul.f32 %v654_v5, %v1507_v1 }
  0xd0   :  { %v675_v16 = vpack.c.bf16 %v657_v11, %v647_v59  ;;  %v662_v17 = vpop.permute.xlu1 %661  ;;  %v660_v19 = vpop.permute.xlu0 %659  ;;  %v676_v20 = vpack.c.bf16 %v658_v12, %v648_v62 }
  0xd1   :  { %v663_v21 = vsel %vm113_vm7, %v660_v19, %v662_v17  ;;  %v664_v24 = vsel %vm113_vm7, %v662_v17, %v660_v19 }
  0xd2   :  { %v667_v25 = vmul.f32 %v663_v21, %v1526_v23  ;;  %v668_v26 = vmul.f32 %v664_v24, %v1521_v22  ;;  %691 = vmatprep.subr.bf16.mxu0 %v676_v20 }
  0xd3   :  { %692 = vmatpush1.bf16.msra.mxu0 %v675_v16 }
  0xd4   :  { %v677_v27 = vpack.c.bf16 %v667_v25, %v667_v25  ;;  %v678_v28 = vpack.c.bf16 %v668_v26, %v668_v26  ;;  %v858_v29 = vpop.permute.xlu1 %857  ;;  %v856_v30 = vpop.permute.xlu0 %855 }
  0xd5   :  { %v859_v33 = vsel %vm36_vm1, %v856_v30, %v858_v29  ;;  %v860_v34 = vsel %vm36_vm1, %v858_v29, %v856_v30 }
  0xd6   :  { %1136 = vmatprep.subr.msk.bf16.mxu0 %vm139_vm8, %v678_v28  ;;  %v680_v37 = vsel %vm139_vm8, %v677_v27, 0  ;;  %v863_v38 = vmul.f32 %v860_v34, %v1400_v15  ;;  %v864_v39 = vmul.f32 %v859_v33, %v1390_v13 }
  0xd7   :  { %694 = vmatpush1.bf16.msra.mxu0 %v680_v37 }
  0xd8   :  { %v868_v40 = vpop.permute.xlu1 %867  ;;  %v866_v41 = vpop.permute.xlu0 %865 }
  0xd9   :  { %v869_v42 = vsel %vm47_vm0, %v866_v41, %v868_v40  ;;  %v870_v44 = vsel %vm47_vm0, %v868_v40, %v866_v41 }
  0xda   :  { %v873_v4 = vmul.f32 %v870_v44, %v1405_v18  ;;  %v874_v3 = vmul.f32 %v869_v42, %v1395_v14  ;;  %1137 = vmatmul.mubr.msk.bf16.vlgmr.msra.gmra.mrb[8].mxu0 %vm135_vm9, %v1543_v43 }
  0xdb   :  { %983 = vmatprep.mubr.bf16.mxu0 %v1183_v2 }
  0xdc   :  { %v935_v45 = vpack.c.bf16 %v873_v4, %v863_v38  ;;  %v878_v48 = vpop.permute.xlu1 %877  ;;  %v876_v49 = vpop.permute.xlu0 %875  ;;  %v936_v50 = vpack.c.bf16 %v874_v3, %v864_v39 }
  0xdd   :  { %v879_v51 = vsel %vm58_vm2, %v876_v49, %v878_v48  ;;  %v880_v52 = vsel %vm58_vm2, %v878_v48, %v876_v49 }
  0xde   :  { %951 = vmatprep.subr.bf16.mxu0 %v936_v50  ;;  %v883_v53 = vmul.f32 %v880_v52, %v1427_v31  ;;  %v884_v54 = vmul.f32 %v879_v51, %v1432_v32 }
  0xdf   :  { %952 = vmatpush1.bf16.msra.mxu0 %v935_v45 }
  0xe0   :  { %v888_v55 = vpop.permute.xlu1 %887  ;;  %v886_v56 = vpop.permute.xlu0 %885 }
  0xe1   :  { %v889_v57 = vsel %vm69_vm3, %v886_v56, %v888_v55  ;;  %v890_v58 = vsel %vm69_vm3, %v888_v55, %v886_v56 }
  0xe2   :  { %v893_v59 = vmul.f32 %v890_v58, %v1446_v35  ;;  %v894_v62 = vmul.f32 %v889_v57, %v1451_v36 }
  0xe4   :  { %v937_v63 = vpack.c.bf16 %v893_v59, %v883_v53  ;;  %v898_v9 = vpop.permute.xlu1 %897  ;;  %v896_v6 = vpop.permute.xlu0 %895  ;;  %v938_v5 = vpack.c.bf16 %v894_v62, %v884_v54 }
  0xe5   :  { %v899_v11 = vsel %vm80_vm4, %v896_v6, %v898_v9  ;;  %v900_v12 = vsel %vm80_vm4, %v898_v9, %v896_v6 }
  0xe6   :  { %v903_v16 = vmul.f32 %v899_v11, %v1468_v46  ;;  %v904_v17 = vmul.f32 %v900_v12, %v1473_v47  ;;  %953 = vmatprep.subr.bf16.mxu0 %v938_v5 }
  0xe7   :  { %954 = vmatpush1.bf16.msra.mxu0 %v937_v63 }
  0xe8   :  { %v939_v19 = vpack.c.bf16 %v903_v16, %v1357_v8  ;;  %v908_v20 = vpop.permute.xlu1 %907  ;;  %v906_v21 = vpop.permute.xlu0 %905  ;;  %v940_v24 = vpack.c.bf16 %v904_v17, %v1352_v7 }
  0xe9   :  { %v909_v25 = vsel %vm91_vm5, %v906_v21, %v908_v20  ;;  %v910_v26 = vsel %vm91_vm5, %v908_v20, %v906_v21 }
  0xea   :  { %955 = vmatprep.subr.bf16.mxu0 %v940_v24  ;;  %v913_v27 = vmul.f32 %v909_v25, %v1487_v60  ;;  %v914_v28 = vmul.f32 %v910_v26, %v1493_v61 }
  0xeb   :  { %956 = vmatpush1.bf16.msra.mxu0 %v939_v19 }
  0xec   :  { %v918_v29 = vpop.permute.xlu1 %917  ;;  %v916_v30 = vpop.permute.xlu0 %915 }
  0xed   :  { %v919_v8 = vsel %vm102_vm6, %v916_v30, %v918_v29  ;;  %v920_v7 = vsel %vm102_vm6, %v918_v29, %v916_v30 }
  0xee   :  { %v923_v33 = vmul.f32 %v919_v8, %v1502_v0  ;;  %v924_v34 = vmul.f32 %v920_v7, %v1507_v1 }
  0xf0   :  { %v941_v37 = vpack.c.bf16 %v923_v33, %v913_v27  ;;  %v928_v38 = vpop.permute.xlu1 %927  ;;  %v926_v39 = vpop.permute.xlu0 %925  ;;  %v942_v40 = vpack.c.bf16 %v924_v34, %v914_v28 }
  0xf1   :  { %v929_v41 = vsel %vm113_vm7, %v926_v39, %v928_v38  ;;  %v930_v42 = vsel %vm113_vm7, %v928_v38, %v926_v39 }
  0xf2   :  { %v933_v44 = vmul.f32 %v929_v41, %v1526_v23  ;;  %v934_v4 = vmul.f32 %v930_v42, %v1521_v22  ;;  %957 = vmatprep.subr.bf16.mxu0 %v942_v40 }
  0xf3   :  { %958 = vmatpush1.bf16.msra.mxu0 %v941_v37 }
  0xf4   :  { %v943_v3 = vpack.c.bf16 %v933_v44, %v933_v44  ;;  %v944_v45 = vpack.c.bf16 %v934_v4, %v934_v4 }
  0xf6   :  { %1144 = vmatprep.subr.msk.bf16.mxu0 %vm139_vm8, %v944_v45  ;;  %v946_v48 = vsel %vm139_vm8, %v943_v3, 0 }
  0xf7   :  { %960 = vmatpush1.bf16.msra.mxu0 %v946_v48 }
  0xfa   :  { %1145 = vmatmul.mubr.msk.bf16.vlgmr.msra.gmra.mrb[12].mxu0 %vm135_vm9, %v1543_v43 }
 0x101   :  { %v1708_v49 = vpop.permute.xlu0 %132 }
 0x16d   :  { %v180_v50 = vpop.f32.mrb[0].mxu0 }
 0x16e   :  { %v181_v51 = vadd.f32 %v180_v50, %v1708_v49  ;;  %v182_v52 = vpop.f32.mrb[1].mxu0  ;;  %v27_v50 = vld [vmem:[%s2197_s4] sm:$0xff] }
 0x16f   :  { %v184_v53 = vpop.f32.mrb[2].mxu0  ;;  %v183_v55 = vadd.f32 %v182_v52, %v1708_v49 }
 0x170   :  { %v1711_v54 = vmax.f32 %v181_v51, 0.0  ;;  %v185_v56 = vpop.f32.mrb[3].mxu0 }
 0x171   :  { %v1718_v57 = vmax.f32 %v183_v55, 0.0 }
 0x172   :  { %197 = vrot.lane.b32.xlu0 %v1711_v54, %s1176_s23  ;;  %189 = vrot.lane.b32.xlu1 %v1711_v54, %s1177_s24 }
 0x176   :  { %205 = vrot.lane.b32.xlu0 %v1711_v54, %s1178_s27  ;;  %191 = vrot.lane.b32.xlu1 %v1718_v57, %s1177_s24 }
 0x17a   :  { %213 = vrot.lane.b32.xlu0 %v1711_v54, %s1179_s28  ;;  %199 = vrot.lane.b32.xlu1 %v1718_v57, %s1176_s23 }
 0x17e   :  { %221 = vrot.lane.b32.xlu0 %v1711_v54, %s1180_s29  ;;  %207 = vrot.lane.b32.xlu1 %v1718_v57, %s1178_s27 }
 0x182   :  { %229 = vrot.lane.b32.xlu0 %v1711_v54, %s1181_s30  ;;  %215 = vrot.lane.b32.xlu1 %v1718_v57, %s1179_s28 }
 0x186   :  { %237 = vrot.lane.b32.xlu0 %v1711_v54, %s1182_s7  ;;  %223 = vrot.lane.b32.xlu1 %v1718_v57, %s1180_s29 }
 0x18a   :  { %245 = vrot.lane.b32.xlu0 %v1711_v54, %s1184_s8  ;;  %231 = vrot.lane.b32.xlu1 %v1718_v57, %s1181_s30 }
 0x18d   :  { %v453_v43 = vpop.f32.mrb[4].mxu0 }
 0x18e   :  { %v454_v58 = vadd.f32 %v453_v43, %v1708_v49  ;;  %v455_v59 = vpop.f32.mrb[5].mxu0  ;;  %239 = vrot.lane.b32.xlu1 %v1718_v57, %s1182_s7 }
 0x18f   :  { %v457_v62 = vpop.f32.mrb[6].mxu0  ;;  %v456_v9 = vadd.f32 %v455_v59, %v1708_v49 }
 0x190   :  { %v1747_v63 = vmax.f32 %v454_v58, 0.0  ;;  %v458_v6 = vpop.f32.mrb[7].mxu0 }
 0x191   :  { %v1754_v5 = vmax.f32 %v456_v9, 0.0 }
 0x192   :  { %462 = vrot.lane.b32.xlu0 %v1747_v63, %s1177_s24  ;;  %247 = vrot.lane.b32.xlu1 %v1718_v57, %s1184_s8 }
 0x196   :  { %470 = vrot.lane.b32.xlu0 %v1747_v63, %s1176_s23  ;;  %464 = vrot.lane.b32.xlu1 %v1754_v5, %s1177_s24 }
 0x19a   :  { %478 = vrot.lane.b32.xlu0 %v1747_v63, %s1178_s27  ;;  %472 = vrot.lane.b32.xlu1 %v1754_v5, %s1176_s23 }
 0x19e   :  { %486 = vrot.lane.b32.xlu0 %v1747_v63, %s1179_s28  ;;  %480 = vrot.lane.b32.xlu1 %v1754_v5, %s1178_s27 }
 0x1a2   :  { %494 = vrot.lane.b32.xlu0 %v1747_v63, %s1180_s29  ;;  %488 = vrot.lane.b32.xlu1 %v1754_v5, %s1179_s28 }
 0x1a6   :  { %502 = vrot.lane.b32.xlu0 %v1747_v63, %s1181_s30  ;;  %496 = vrot.lane.b32.xlu1 %v1754_v5, %s1180_s29 }
 0x1aa   :  { %510 = vrot.lane.b32.xlu0 %v1747_v63, %s1182_s7  ;;  %504 = vrot.lane.b32.xlu1 %v1754_v5, %s1181_s30 }
 0x1ad   :  { %v719_v11 = vpop.f32.mrb[8].mxu0 }
 0x1ae   :  { %v720_v12 = vadd.f32 %v719_v11, %v1708_v49  ;;  %v721_v16 = vpop.f32.mrb[9].mxu0  ;;  %518 = vrot.lane.b32.xlu0 %v1747_v63, %s1184_s8  ;;  %512 = vrot.lane.b32.xlu1 %v1754_v5, %s1182_s7 }
 0x1af   :  { %v723_v17 = vpop.f32.mrb[10].mxu0  ;;  %v722_v20 = vadd.f32 %v721_v16, %v1708_v49 }
 0x1b0   :  { %v1785_v19 = vmax.f32 %v720_v12, 0.0  ;;  %v724_v21 = vpop.f32.mrb[11].mxu0 }
 0x1b1   :  { %v1792_v24 = vmax.f32 %v722_v20, 0.0 }
 0x1b2   :  { %728 = vrot.lane.b32.xlu0 %v1785_v19, %s1177_s24  ;;  %520 = vrot.lane.b32.xlu1 %v1754_v5, %s1184_s8 }
 0x1b6   :  { %736 = vrot.lane.b32.xlu0 %v1785_v19, %s1176_s23  ;;  %730 = vrot.lane.b32.xlu1 %v1792_v24, %s1177_s24 }
 0x1ba   :  { %744 = vrot.lane.b32.xlu0 %v1785_v19, %s1178_s27  ;;  %738 = vrot.lane.b32.xlu1 %v1792_v24, %s1176_s23 }
 0x1be   :  { %752 = vrot.lane.b32.xlu0 %v1785_v19, %s1179_s28  ;;  %746 = vrot.lane.b32.xlu1 %v1792_v24, %s1178_s27 }
 0x1c2   :  { %760 = vrot.lane.b32.xlu0 %v1785_v19, %s1180_s29  ;;  %754 = vrot.lane.b32.xlu1 %v1792_v24, %s1179_s28 }
 0x1c6   :  { %768 = vrot.lane.b32.xlu0 %v1785_v19, %s1181_s30  ;;  %762 = vrot.lane.b32.xlu1 %v1792_v24, %s1180_s29 }
 0x1ca   :  { %776 = vrot.lane.b32.xlu0 %v1785_v19, %s1182_s7  ;;  %770 = vrot.lane.b32.xlu1 %v1792_v24, %s1181_s30 }
 0x1cd   :  { %v985_v25 = vpop.f32.mrb[12].mxu0 }
 0x1ce   :  { %v986_v26 = vadd.f32 %v985_v25, %v1708_v49  ;;  %v987_v27 = vpop.f32.mrb[13].mxu0  ;;  %784 = vrot.lane.b32.xlu0 %v1785_v19, %s1184_s8  ;;  %778 = vrot.lane.b32.xlu1 %v1792_v24, %s1182_s7 }
 0x1cf   :  { %v989_v28 = vpop.f32.mrb[14].mxu0  ;;  %v988_v30 = vadd.f32 %v987_v27, %v1708_v49 }
 0x1d0   :  { %v1823_v29 = vmax.f32 %v986_v26, 0.0  ;;  %v990_v8 = vpop.f32.mrb[15].mxu0 }
 0x1d1   :  { %v1830_v7 = vmax.f32 %v988_v30, 0.0 }
 0x1d2   :  { %994 = vrot.lane.b32.xlu0 %v1823_v29, %s1177_s24  ;;  %786 = vrot.lane.b32.xlu1 %v1792_v24, %s1184_s8 }
 0x1d6   :  { %1002 = vrot.lane.b32.xlu0 %v1823_v29, %s1176_s23  ;;  %996 = vrot.lane.b32.xlu1 %v1830_v7, %s1177_s24 }
 0x1da   :  { %1010 = vrot.lane.b32.xlu0 %v1823_v29, %s1178_s27  ;;  %1004 = vrot.lane.b32.xlu1 %v1830_v7, %s1176_s23 }
 0x1de   :  { %1018 = vrot.lane.b32.xlu0 %v1823_v29, %s1179_s28  ;;  %1012 = vrot.lane.b32.xlu1 %v1830_v7, %s1178_s27 }
 0x1e2   :  { %1026 = vrot.lane.b32.xlu0 %v1823_v29, %s1180_s29  ;;  %1020 = vrot.lane.b32.xlu1 %v1830_v7, %s1179_s28 }
 0x1e4   :  { %v198_v33 = vpop.permute.xlu0 %197  ;;  %v190_v34 = vpop.permute.xlu1 %189 }
 0x1e6   :  { %1034 = vrot.lane.b32.xlu0 %v1823_v29, %s1181_s30  ;;  %1028 = vrot.lane.b32.xlu1 %v1830_v7, %s1180_s29 }
 0x1e8   :  { %v206_v37 = vpop.permute.xlu0 %205  ;;  %v192_v38 = vpop.permute.xlu1 %191 }
 0x1e9   :  { %v194_v39 = vsel %vm36_vm1, %v192_v38, %v190_v34  ;;  %v193_v40 = vsel %vm36_vm1, %v190_v34, %v192_v38 }
 0x1ea   :  { %1042 = vrot.lane.b32.xlu0 %v1823_v29, %s1182_s7  ;;  %1036 = vrot.lane.b32.xlu1 %v1830_v7, %s1181_s30  ;;  %v195_v44 = vmul.f32 %v194_v39, %v1400_v15  ;;  %v196_v48 = vmul.f32 %v193_v40, %v1390_v13 }
 0x1ec   :  { %v214_v41 = vpop.permute.xlu0 %213  ;;  %v200_v42 = vpop.permute.xlu1 %199 }
 0x1ed   :  { %v201_v4 = vsel %vm47_vm0, %v198_v33, %v200_v42  ;;  %v202_v3 = vsel %vm47_vm0, %v200_v42, %v198_v33 }
 0x1ee   :  { %v203_v45 = vmul.f32 %v202_v3, %v1405_v18  ;;  %1050 = vrot.lane.b32.xlu0 %v1823_v29, %s1184_s8  ;;  %1044 = vrot.lane.b32.xlu1 %v1830_v7, %s1182_s7  ;;  %v204_v49 = vmul.f32 %v201_v4, %v1395_v14 }
 0x1f0   :  { %v222_v51 = vpop.permute.xlu0 %221  ;;  %v208_v52 = vpop.permute.xlu1 %207  ;;  %v254_v53 = vpack.c.bf16 %v204_v49, %v196_v48  ;;  %v253_v55 = vpack.c.bf16 %v203_v45, %v195_v44 }
 0x1f1   :  { %v209_v56 = vsel %vm58_vm2, %v206_v37, %v208_v52  ;;  %v210_v43 = vsel %vm58_vm2, %v208_v52, %v206_v37 }
 0x1f2   :  { %265 = vperm.xlu0 %1159, %v27_v50   ;;  %1052 = vrot.lane.b32.xlu1 %v1830_v7, %s1184_s8  ;;  %v211_v6 = vmul.f32 %v210_v43, %v1427_v31  ;;  %v212_v11 = vmul.f32 %v209_v56, %v1432_v32 }
 0x1f3   :  { %277 = vmatprep.subr.bf16.mxu1 %v254_v53 }
 0x1f4   :  { %278 = vmatpush1.bf16.msra.mxu1 %v253_v55  ;;  %v230_v58 = vpop.permute.xlu0 %229  ;;  %v216_v59 = vpop.permute.xlu1 %215 }
 0x1f5   :  { %v217_v62 = vsel %vm69_vm3, %v214_v41, %v216_v59  ;;  %v218_v9 = vsel %vm69_vm3, %v216_v59, %v214_v41 }
 0x1f6   :  { %v219_v12 = vmul.f32 %v218_v9, %v1446_v35  ;;  %v220_v16 = vmul.f32 %v217_v62, %v1451_v36 }
 0x1f8   :  { %v224_v17 = vpop.permute.xlu1 %223  ;;  %v256_v20 = vpack.c.bf16 %v220_v16, %v212_v11  ;;  %v255_v21 = vpack.c.bf16 %v219_v12, %v211_v6  ;;  %v238_v27 = vpop.permute.xlu0 %237  ;;  %v1924_v6 = vld [vmem:[%s2198_s3] sm:$0xf] }
 0x1f9   :  { %v225_v25 = vsel %vm80_vm4, %v222_v51, %v224_v17  ;;  %v226_v26 = vsel %vm80_vm4, %v224_v17, %v222_v51 }
 0x1fa   :  { %v227_v28 = vmul.f32 %v225_v25, %v1468_v46  ;;  %v228_v30 = vmul.f32 %v226_v26, %v1473_v47  ;;  %279 = vmatprep.subr.bf16.mxu1 %v256_v20 }
 0x1fb   :  { %280 = vmatpush1.bf16.msra.mxu1 %v255_v21 }
 0x1fc   :  { %v232_v8 = vpop.permute.xlu1 %231  ;;  %v258_v33 = vpack.c.bf16 %v228_v30, %v1718_v57  ;;  %v257_v34 = vpack.c.bf16 %v227_v28, %v1711_v54  ;;  %v246_v39 = vpop.permute.xlu0 %245 }
 0x1fd   :  { %v233_v37 = vsel %vm91_vm5, %v230_v58, %v232_v8  ;;  %v234_v38 = vsel %vm91_vm5, %v232_v8, %v230_v58 }
 0x1fe   :  { %281 = vmatprep.subr.bf16.mxu1 %v258_v33  ;;  %v235_v57 = vmul.f32 %v233_v37, %v1487_v60  ;;  %v236_v54 = vmul.f32 %v234_v38, %v1493_v61 }
 0x1ff   :  { %282 = vmatpush1.bf16.msra.mxu1 %v257_v34 }
 0x200   :  { %v240_v40 = vpop.permute.xlu1 %239 }
 0x201   :  { %v241_v41 = vsel %vm102_vm6, %v238_v27, %v240_v40  ;;  %v242_v42 = vsel %vm102_vm6, %v240_v40, %v238_v27 }
 0x202   :  { %v243_v44 = vmul.f32 %v241_v41, %v1502_v0  ;;  %v244_v4 = vmul.f32 %v242_v42, %v1507_v1 }
 0x204   :  { %v463_v3 = vpop.permute.xlu0 %462  ;;  %v248_v45 = vpop.permute.xlu1 %247  ;;  %v260_v48 = vpack.c.bf16 %v244_v4, %v236_v54  ;;  %v259_v49 = vpack.c.bf16 %v243_v44, %v235_v57 }
 0x205   :  { %v249_v50 = vsel %vm113_vm7, %v246_v39, %v248_v45  ;;  %v250_v51 = vsel %vm113_vm7, %v248_v45, %v246_v39 }
 0x206   :  { %v251_v52 = vmul.f32 %v249_v50, %v1526_v23  ;;  %v252_v53 = vmul.f32 %v250_v51, %v1521_v22  ;;  %283 = vmatprep.subr.bf16.mxu1 %v260_v48 }
 0x207   :  { %284 = vmatpush1.bf16.msra.mxu1 %v259_v49 }
 0x208   :  { %v261_v55 = vpack.c.bf16 %v251_v52, %v251_v52  ;;  %v262_v56 = vpack.c.bf16 %v252_v53, %v252_v53  ;;  %v471_v43 = vpop.permute.xlu0 %470  ;;  %v465_v58 = vpop.permute.xlu1 %464 }
 0x209   :  { %v466_v62 = vsel %vm36_vm1, %v463_v3, %v465_v58  ;;  %v467_v9 = vsel %vm36_vm1, %v465_v58, %v463_v3 }
 0x20a   :  { %1124 = vmatprep.subr.msk.bf16.mxu1 %vm139_vm8, %v262_v56  ;;  %v272_v59 = vsel %vm139_vm8, %v261_v55, 0  ;;  %v468_v20 = vmul.f32 %v467_v9, %v1400_v15  ;;  %v469_v21 = vmul.f32 %v466_v62, %v1390_v13 }
 0x20b   :  { %286 = vmatpush1.bf16.msra.mxu1 %v272_v59 }
 0x20c   :  { %v479_v11 = vpop.permute.xlu0 %478  ;;  %v473_v12 = vpop.permute.xlu1 %472 }
 0x20d   :  { %v474_v16 = vsel %vm47_vm0, %v471_v43, %v473_v12  ;;  %v475_v17 = vsel %vm47_vm0, %v473_v12, %v471_v43 }
 0x20e   :  { %v476_v25 = vmul.f32 %v475_v17, %v1405_v18  ;;  %v477_v26 = vmul.f32 %v474_v16, %v1395_v14  ;;  %1125 = vmatmul.mubr.msk.bf16.vlgmr.msra.gmra.mrb[0].mxu1 %vm135_vm9, %v1924_v6 }
 0x20f   :  { %574 = vmatprep.mubr.bf16.mxu1 %v1183_v2 }
 0x210   :  { %v526_v27 = vpack.c.bf16 %v476_v25, %v468_v20  ;;  %v487_v28 = vpop.permute.xlu0 %486  ;;  %v481_v30 = vpop.permute.xlu1 %480  ;;  %v527_v8 = vpack.c.bf16 %v477_v26, %v469_v21  ;;  %v1988_v25 = vld [vmem:[%s2194_s5] sm:$0xff] }
 0x211   :  { %v482_v33 = vsel %vm58_vm2, %v479_v11, %v481_v30  ;;  %v483_v13 = vsel %vm58_vm2, %v481_v30, %v479_v11  ;;  %v2000_v30 = vld [vmem:[%s2194_s5 + $0x10] sm:$0xff] }
 0x212   :  { %542 = vmatprep.subr.bf16.mxu1 %v527_v8  ;;  %v484_v37 = vmul.f32 %v483_v13, %v1427_v31  ;;  %v485_v38 = vmul.f32 %v482_v33, %v1432_v32  ;;  %v2006_v33 = vld [vmem:[%s2194_s5 + $0x18] sm:$0xff] }
 0x213   :  { %543 = vmatpush1.bf16.msra.mxu1 %v526_v27  ;;  %v1994_v27 = vld [vmem:[%s2194_s5 + $0x8] sm:$0xff] }
 0x214   :  { %v495_v15 = vpop.permute.xlu0 %494  ;;  %v489_v18 = vpop.permute.xlu1 %488 }
 0x215   :  { %v490_v14 = vsel %vm69_vm3, %v487_v28, %v489_v18  ;;  %v491_v34 = vsel %vm69_vm3, %v489_v18, %v487_v28 }
 0x216   :  { %v492_v39 = vmul.f32 %v491_v34, %v1446_v35  ;;  %v493_v40 = vmul.f32 %v490_v14, %v1451_v36 }
 0x218   :  { %v528_v41 = vpack.c.bf16 %v492_v39, %v484_v37  ;;  %v503_v42 = vpop.permute.xlu0 %502  ;;  %v497_v57 = vpop.permute.xlu1 %496  ;;  %v529_v54 = vpack.c.bf16 %v493_v40, %v485_v38 }
 0x219   :  { %v498_v44 = vsel %vm80_vm4, %v495_v15, %v497_v57  ;;  %v499_v4 = vsel %vm80_vm4, %v497_v57, %v495_v15  ;;  %v2023_v57 = vld [vmem:[%s2194_s5 + $0x20] sm:$0xff] }
 0x21a   :  { %v500_v3 = vmul.f32 %v498_v44, %v1468_v46  ;;  %v501_v31 = vmul.f32 %v499_v4, %v1473_v47  ;;  %544 = vmatprep.subr.bf16.mxu1 %v529_v54  ;;  %v2029_v44 = vld [vmem:[%s2194_s5 + $0x28] sm:$0xff] }
 0x21b   :  { %545 = vmatpush1.bf16.msra.mxu1 %v528_v41 }
 0x21c   :  { %v530_v32 = vpack.c.bf16 %v500_v3, %v1747_v63  ;;  %v511_v35 = vpop.permute.xlu0 %510  ;;  %v505_v36 = vpop.permute.xlu1 %504  ;;  %v531_v45 = vpack.c.bf16 %v501_v31, %v1754_v5  ;;  %v2035_v3 = vld [vmem:[%s2194_s5 + $0x30] sm:$0xff] }
 0x21d   :  { %v506_v48 = vsel %vm91_vm5, %v503_v42, %v505_v36  ;;  %v507_v49 = vsel %vm91_vm5, %v505_v36, %v503_v42 }
 0x21e   :  { %546 = vmatprep.subr.bf16.mxu1 %v531_v45  ;;  %v508_v51 = vmul.f32 %v506_v48, %v1487_v60  ;;  %v509_v5 = vmul.f32 %v507_v49, %v1493_v61 }
 0x21f   :  { %547 = vmatpush1.bf16.msra.mxu1 %v530_v32  ;;  %v2041_v32 = vld [vmem:[%s2194_s5 + $0x38] sm:$0xff] }
 0x220   :  { %v519_v50 = vpop.permute.xlu0 %518  ;;  %v513_v46 = vpop.permute.xlu1 %512 }
 0x221   :  { %v514_v47 = vsel %vm102_vm6, %v511_v35, %v513_v46  ;;  %v515_v63 = vsel %vm102_vm6, %v513_v46, %v511_v35 }
 0x222   :  { %v516_v52 = vmul.f32 %v514_v47, %v1502_v0  ;;  %v517_v53 = vmul.f32 %v515_v63, %v1507_v1  ;;  %v2051_v47 = vld [vmem:[%s2194_s5 + $0x50] sm:$0xff] }
 0x224   :  { %v532_v55 = vpack.c.bf16 %v516_v52, %v508_v51  ;;  %v729_v56 = vpop.permute.xlu0 %728  ;;  %v521_v43 = vpop.permute.xlu1 %520  ;;  %v533_v58 = vpack.c.bf16 %v517_v53, %v509_v5  ;;  %v2057_v51 = vld [vmem:[%s2194_s5 + $0x58] sm:$0xff] }
 0x225   :  { %v522_v59 = vsel %vm113_vm7, %v519_v50, %v521_v43  ;;  %v523_v62 = vsel %vm113_vm7, %v521_v43, %v519_v50 }
 0x226   :  { %v524_v9 = vmul.f32 %v522_v59, %v1526_v23  ;;  %v525_v60 = vmul.f32 %v523_v62, %v1521_v22  ;;  %548 = vmatprep.subr.bf16.mxu1 %v533_v58 }
 0x227   :  { %549 = vmatpush1.bf16.msra.mxu1 %v532_v55 }
 0x228   :  { %v534_v61 = vpack.c.bf16 %v524_v9, %v524_v9  ;;  %v535_v0 = vpack.c.bf16 %v525_v60, %v525_v60  ;;  %v737_v11 = vpop.permute.xlu0 %736  ;;  %v731_v1 = vpop.permute.xlu1 %730 }
 0x229   :  { %v732_v16 = vsel %vm36_vm1, %v729_v56, %v731_v1  ;;  %v733_v17 = vsel %vm36_vm1, %v731_v1, %v729_v56 }
 0x22a   :  { %1130 = vmatprep.subr.msk.bf16.mxu1 %vm139_vm8, %v535_v0  ;;  %v537_v12 = vsel %vm139_vm8, %v534_v61, 0  ;;  %v734_v26 = vmul.f32 %v1988_v25, %v733_v17  ;;  %v735_v28 = vmul.f32 %v1994_v27, %v732_v16  ;;  %v2079_v61 = vld [vmem:[%s2194_s5 + $0x68] sm:$0xff] }
 0x22b   :  { %551 = vmatpush1.bf16.msra.mxu1 %v537_v12  ;;  %v2091_v12 = vld [vmem:[%s2194_s5 + $0x78] sm:$0xff] }
 0x22c   :  { %v745_v23 = vpop.permute.xlu0 %744  ;;  %v739_v20 = vpop.permute.xlu1 %738 }
 0x22d   :  { %v740_v22 = vsel %vm47_vm0, %v737_v11, %v739_v20  ;;  %v741_v21 = vsel %vm47_vm0, %v739_v20, %v737_v11  ;;  %v2085_v11 = vld [vmem:[%s2194_s5 + $0x70] sm:$0xff] }
 0x22e   :  { %v742_v8 = vmul.f32 %v2000_v30, %v741_v21  ;;  %v743_v13 = vmul.f32 %v2006_v33, %v740_v22  ;;  %1131 = vmatmul.mubr.msk.bf16.vlgmr.msra.gmra.mrb[4].mxu1 %vm135_vm9, %v1924_v6 }
 0x22f   :  { %840 = vmatprep.mubr.bf16.mxu1 %v1183_v2 }
 0x230   :  { %v792_v15 = vpack.c.bf16 %v742_v8, %v734_v26  ;;  %v753_v18 = vpop.permute.xlu0 %752  ;;  %v747_v14 = vpop.permute.xlu1 %746  ;;  %v793_v34 = vpack.c.bf16 %v743_v13, %v735_v28  ;;  %v2101_v28 = vld [vmem:[%s2194_s5 + $0x80] sm:$0xff]  ;;  %v2107_v13 = vld [vmem:[%s2194_s5 + $0x88] sm:$0xff] }
 0x231   :  { %v748_v37 = vsel %vm58_vm2, %v745_v23, %v747_v14  ;;  %v749_v38 = vsel %vm58_vm2, %v747_v14, %v745_v23 }
 0x232   :  { %808 = vmatprep.subr.bf16.mxu1 %v793_v34  ;;  %v750_v54 = vmul.f32 %v2023_v57, %v749_v38  ;;  %v751_v4 = vmul.f32 %v2029_v44, %v748_v37 }
 0x233   :  { %809 = vmatpush1.bf16.msra.mxu1 %v792_v15 }
 0x234   :  { %v761_v39 = vpop.permute.xlu0 %760  ;;  %v755_v40 = vpop.permute.xlu1 %754 }
 0x235   :  { %v756_v41 = vsel %vm69_vm3, %v753_v18, %v755_v40  ;;  %v757_v42 = vsel %vm69_vm3, %v755_v40, %v753_v18 }
 0x236   :  { %v758_v31 = vmul.f32 %v2035_v3, %v757_v42  ;;  %v759_v35 = vmul.f32 %v2041_v32, %v756_v41 }
 0x238   :  { %v794_v36 = vpack.c.bf16 %v758_v31, %v750_v54  ;;  %v769_v45 = vpop.permute.xlu0 %768  ;;  %v763_v48 = vpop.permute.xlu1 %762  ;;  %v795_v49 = vpack.c.bf16 %v759_v35, %v751_v4 }
 0x239   :  { %v764_v50 = vsel %vm80_vm4, %v761_v39, %v763_v48  ;;  %v765_v46 = vsel %vm80_vm4, %v763_v48, %v761_v39 }
 0x23a   :  { %v766_v63 = vmul.f32 %v2051_v47, %v764_v50  ;;  %v767_v5 = vmul.f32 %v2057_v51, %v765_v46  ;;  %810 = vmatprep.subr.bf16.mxu1 %v795_v49 }
 0x23b   :  { %811 = vmatpush1.bf16.msra.mxu1 %v794_v36 }
 0x23c   :  { %v796_v52 = vpack.c.bf16 %v766_v63, %v1785_v19  ;;  %v777_v53 = vpop.permute.xlu0 %776  ;;  %v771_v55 = vpop.permute.xlu1 %770  ;;  %v797_v56 = vpack.c.bf16 %v767_v5, %v1792_v24  ;;  %v2073_v24 = vld [vmem:[%s2194_s5 + $0x60] sm:$0xff] }
 0x23d   :  { %v772_v43 = vsel %vm91_vm5, %v769_v45, %v771_v55  ;;  %v773_v58 = vsel %vm91_vm5, %v771_v55, %v769_v45 }
 0x23e   :  { %812 = vmatprep.subr.bf16.mxu1 %v797_v56  ;;  %v774_v60 = vmul.f32 %v2073_v24, %v772_v43  ;;  %v775_v0 = vmul.f32 %v2079_v61, %v773_v58 }
 0x23f   :  { %813 = vmatpush1.bf16.msra.mxu1 %v796_v52 }
 0x240   :  { %v785_v59 = vpop.permute.xlu0 %784  ;;  %v779_v62 = vpop.permute.xlu1 %778 }
 0x241   :  { %v780_v9 = vsel %vm102_vm6, %v777_v53, %v779_v62  ;;  %v781_v19 = vsel %vm102_vm6, %v779_v62, %v777_v53 }
 0x242   :  { %v782_v1 = vmul.f32 %v2085_v11, %v780_v9  ;;  %v783_v16 = vmul.f32 %v2091_v12, %v781_v19 }
 0x244   :  { %v798_v17 = vpack.c.bf16 %v782_v1, %v774_v60  ;;  %v995_v23 = vpop.permute.xlu0 %994  ;;  %v787_v20 = vpop.permute.xlu1 %786  ;;  %v799_v22 = vpack.c.bf16 %v783_v16, %v775_v0 }
 0x245   :  { %v788_v21 = vsel %vm113_vm7, %v785_v59, %v787_v20  ;;  %v789_v26 = vsel %vm113_vm7, %v787_v20, %v785_v59 }
 0x246   :  { %v790_v8 = vmul.f32 %v2101_v28, %v788_v21  ;;  %v791_v15 = vmul.f32 %v2107_v13, %v789_v26  ;;  %814 = vmatprep.subr.bf16.mxu1 %v799_v22 }
 0x247   :  { %815 = vmatpush1.bf16.msra.mxu1 %v798_v17 }
 0x248   :  { %v800_v18 = vpack.c.bf16 %v790_v8, %v790_v8  ;;  %v801_v14 = vpack.c.bf16 %v791_v15, %v791_v15  ;;  %v1003_v34 = vpop.permute.xlu0 %1002  ;;  %v997_v37 = vpop.permute.xlu1 %996 }
 0x249   :  { %v998_v39 = vsel %vm36_vm1, %v995_v23, %v997_v37  ;;  %v999_v40 = vsel %vm36_vm1, %v997_v37, %v995_v23 }
 0x24a   :  { %1138 = vmatprep.subr.msk.bf16.mxu1 %vm139_vm8, %v801_v14  ;;  %v803_v38 = vsel %vm139_vm8, %v800_v18, 0  ;;  %v1000_v31 = vmul.f32 %v1988_v25, %v999_v40  ;;  %v1001_v35 = vmul.f32 %v1994_v27, %v998_v39 }
 0x24b   :  { %817 = vmatpush1.bf16.msra.mxu1 %v803_v38 }
 0x24c   :  { %v1011_v41 = vpop.permute.xlu0 %1010  ;;  %v1005_v42 = vpop.permute.xlu1 %1004 }
 0x24d   :  { %v1006_v54 = vsel %vm47_vm0, %v1003_v34, %v1005_v42  ;;  %v1007_v4 = vsel %vm47_vm0, %v1005_v42, %v1003_v34 }
 0x24e   :  { %v1008_v36 = vmul.f32 %v2000_v30, %v1007_v4  ;;  %v1009_v45 = vmul.f32 %v2006_v33, %v1006_v54  ;;  %1139 = vmatmul.mubr.msk.bf16.vlgmr.msra.gmra.mrb[8].mxu1 %vm135_vm9, %v1924_v6 }
 0x24f   :  { %1106 = vmatprep.mubr.bf16.mxu1 %v1183_v2 }
 0x250   :  { %v1058_v48 = vpack.c.bf16 %v1008_v36, %v1000_v31  ;;  %v1019_v49 = vpop.permute.xlu0 %1018  ;;  %v1013_v50 = vpop.permute.xlu1 %1012  ;;  %v1059_v46 = vpack.c.bf16 %v1009_v45, %v1001_v35 }
 0x251   :  { %v1014_v63 = vsel %vm58_vm2, %v1011_v41, %v1013_v50  ;;  %v1015_v25 = vsel %vm58_vm2, %v1013_v50, %v1011_v41 }
 0x252   :  { %1074 = vmatprep.subr.bf16.mxu1 %v1059_v46  ;;  %v1016_v5 = vmul.f32 %v2023_v57, %v1015_v25  ;;  %v1017_v52 = vmul.f32 %v2029_v44, %v1014_v63 }
 0x253   :  { %1075 = vmatpush1.bf16.msra.mxu1 %v1058_v48 }
 0x254   :  { %v1027_v27 = vpop.permute.xlu0 %1026  ;;  %v1021_v30 = vpop.permute.xlu1 %1020 }
 0x255   :  { %v1022_v33 = vsel %vm69_vm3, %v1019_v49, %v1021_v30  ;;  %v1023_v2 = vsel %vm69_vm3, %v1021_v30, %v1019_v49 }
 0x256   :  { %v1024_v53 = vmul.f32 %v2035_v3, %v1023_v2  ;;  %v1025_v55 = vmul.f32 %v2041_v32, %v1022_v33 }
 0x258   :  { %v1060_v56 = vpack.c.bf16 %v1024_v53, %v1016_v5  ;;  %v1035_v43 = vpop.permute.xlu0 %1034  ;;  %v1029_v58 = vpop.permute.xlu1 %1028  ;;  %v1061_v59 = vpack.c.bf16 %v1025_v55, %v1017_v52 }
 0x259   :  { %v1030_v62 = vsel %vm80_vm4, %v1027_v27, %v1029_v58  ;;  %v1031_v9 = vsel %vm80_vm4, %v1029_v58, %v1027_v27 }
 0x25a   :  { %v1032_v19 = vmul.f32 %v2051_v47, %v1030_v62  ;;  %v1033_v57 = vmul.f32 %v2057_v51, %v1031_v9  ;;  %1076 = vmatprep.subr.bf16.mxu1 %v1061_v59 }
 0x25b   :  { %1077 = vmatpush1.bf16.msra.mxu1 %v1060_v56 }
 0x25c   :  { %v1062_v44 = vpack.c.bf16 %v1032_v19, %v1823_v29  ;;  %v1037_v3 = vpop.permute.xlu1 %1036  ;;  %v1063_v32 = vpack.c.bf16 %v1033_v57, %v1830_v7  ;;  %v1043_v60 = vpop.permute.xlu0 %1042 }
 0x25d   :  { %v1038_v0 = vsel %vm91_vm5, %v1035_v43, %v1037_v3  ;;  %v1039_v1 = vsel %vm91_vm5, %v1037_v3, %v1035_v43 }
 0x25e   :  { %1078 = vmatprep.subr.bf16.mxu1 %v1063_v32  ;;  %v1040_v29 = vmul.f32 %v2073_v24, %v1038_v0  ;;  %v1041_v7 = vmul.f32 %v2079_v61, %v1039_v1 }
 0x25f   :  { %1079 = vmatpush1.bf16.msra.mxu1 %v1062_v44 }
 0x260   :  { %v1045_v16 = vpop.permute.xlu1 %1044  ;;  %v1051_v20 = vpop.permute.xlu0 %1050 }
 0x261   :  { %v1046_v47 = vsel %vm102_vm6, %v1043_v60, %v1045_v16  ;;  %v1047_v51 = vsel %vm102_vm6, %v1045_v16, %v1043_v60 }
 0x262   :  { %v1048_v17 = vmul.f32 %v2085_v11, %v1046_v47  ;;  %v1049_v23 = vmul.f32 %v2091_v12, %v1047_v51 }
 0x264   :  { %v1064_v22 = vpack.c.bf16 %v1048_v17, %v1040_v29  ;;  %v1053_v21 = vpop.permute.xlu1 %1052  ;;  %v1065_v26 = vpack.c.bf16 %v1049_v23, %v1041_v7 }
 0x265   :  { %v1054_v8 = vsel %vm113_vm7, %v1051_v20, %v1053_v21  ;;  %v1055_v15 = vsel %vm113_vm7, %v1053_v21, %v1051_v20 }
 0x266   :  { %v1056_v18 = vmul.f32 %v2101_v28, %v1054_v8  ;;  %v1057_v24 = vmul.f32 %v2107_v13, %v1055_v15  ;;  %1080 = vmatprep.subr.bf16.mxu1 %v1065_v26 }
 0x267   :  { %1081 = vmatpush1.bf16.msra.mxu1 %v1064_v22 }
 0x268   :  { %v1066_v61 = vpack.c.bf16 %v1056_v18, %v1056_v18  ;;  %v1067_v11 = vpack.c.bf16 %v1057_v24, %v1057_v24 }
 0x26a   :  { %1146 = vmatprep.subr.msk.bf16.mxu1 %vm139_vm8, %v1067_v11  ;;  %v1069_v12 = vsel %vm139_vm8, %v1066_v61, 0 }
 0x26b   :  { %1083 = vmatpush1.bf16.msra.mxu1 %v1069_v12 }
 0x26e   :  { %1147 = vmatmul.mubr.msk.bf16.vlgmr.msra.gmra.mrb[12].mxu1 %vm135_vm9, %v1924_v6 }
 0x271   :  { %v266_v14 = vpop.permute.xlu0 %265 }
 0x2e1   :  { %v311_v34 = vpop.f32.mrb[0].mxu1 }
 0x2e2   :  { %v312_v10 = vadd.f32 %v311_v34, %v266_v14  ;;  %v313_v37 = vpop.f32.mrb[1].mxu1 }
 0x2e3   :  { %v314_v38 = vadd.f32 %v313_v37, %v266_v14  ;;  %v315_v28 = vpop.f32.mrb[2].mxu1 }
 0x2e4   :  { %318 = vst [vmem:[%s2199_s6] sm:$0xff] %v312_v10  ;;  %v316_v13 = vpop.f32.mrb[3].mxu1 }
 0x2e5   :  { %319 = vst [vmem:[%s2199_s6 + $0x8] sm:$0xff] %v314_v38 }
 0x301   :  { %v576_v39 = vpop.f32.mrb[4].mxu1 }
 0x302   :  { %v577_v40 = vadd.f32 %v576_v39, %v266_v14  ;;  %v578_v41 = vpop.f32.mrb[5].mxu1 }
 0x303   :  { %v579_v42 = vadd.f32 %v578_v41, %v266_v14  ;;  %v580_v6 = vpop.f32.mrb[6].mxu1 }
 0x304   :  { %1132 = vst [vmem:[%s2199_s6 + $0x10] sm:$0xff] %v577_v40  ;;  %v581_v54 = vpop.f32.mrb[7].mxu1 }
 0x305   :  { %1133 = vst [vmem:[%s2199_s6 + $0x18] sm:$0xff] %v579_v42 }
 0x321   :  { %v842_v4 = vpop.f32.mrb[8].mxu1 }
 0x322   :  { %v843_v31 = vadd.f32 %v842_v4, %v266_v14  ;;  %v844_v35 = vpop.f32.mrb[9].mxu1 }
 0x323   :  { %v845_v36 = vadd.f32 %v844_v35, %v266_v14  ;;  %v846_v45 = vpop.f32.mrb[10].mxu1 }
 0x324   :  { %1140 = vst [vmem:[%s2199_s6 + $0x20] sm:$0xff] %v843_v31  ;;  %v847_v48 = vpop.f32.mrb[11].mxu1 }
 0x325   :  { %1141 = vst [vmem:[%s2199_s6 + $0x28] sm:$0xff] %v845_v36 }
 0x341   :  { %v1108_v49 = vpop.f32.mrb[12].mxu1 }
 0x342   :  { %v1109_v50 = vadd.f32 %v1108_v49, %v266_v14  ;;  %v1110_v46 = vpop.f32.mrb[13].mxu1 }
 0x343   :  { %v1111_v63 = vadd.f32 %v1110_v46, %v266_v14  ;;  %v1112_v25 = vpop.f32.mrb[14].mxu1 }
 0x344   :  { %1148 = vst [vmem:[%s2199_s6 + $0x30] sm:$0xff] %v1109_v50  ;;  %v1113_v27 = vpop.f32.mrb[15].mxu1 }
 0x345   :  { %1149 = vst [vmem:[%s2199_s6 + $0x38] sm:$0xff] %v1111_v63 }

</bundles_post_ra>
